<compile_context>
chip_gen: v6e
topology: v6e:2x2x1
jax: 0.10.0
libtpu: 0.0.40
codegen_flags: <defaults>
</compile_context>

<pallas_src>
import functools

import jax
import jax.numpy as jnp
import numpy as np
from jax.experimental import pallas as pl
from jax.experimental.pallas import tpu as pltpu


# ----------------------------------------------------------------------------
# Kernel helpers
# ----------------------------------------------------------------------------
def _layer_norm(x, g, b, eps):
    """Single-pass LayerNorm: mean and E[x^2] reduced once each."""
    mu = jnp.mean(x, axis=-1, keepdims=True)
    ms = jnp.mean(x * x, axis=-1, keepdims=True)
    var = ms - mu * mu
    return (x - mu) * jax.lax.rsqrt(var + eps) * g + b


# ----------------------------------------------------------------------------
# Kernel: one grid step == one transformer layer over one batch row.
# The output block (index depends only on the batch coord) carries the
# activation from layer to layer entirely inside VMEM.
# ----------------------------------------------------------------------------
def _fused_transformer_kernel(
    x_ref, mask_ref,
    ln1_g, ln1_b, wqkv, bqkv, wo, bo,
    ln2_g, ln2_b, w1, b1, w2, b2,
    out_ref, ctx_buf,
    *, n_heads, d_key, d_value, matmul_dtype,
):
    layer = pl.program_id(1)

    # Layer 0: seed the VMEM-resident activation from the kernel input.
    @pl.when(layer == 0)
    def _():
        out_ref[...] = x_ref[...]

    mdt = matmul_dtype
    H, dk, dv = n_heads, d_key, d_value
    x = out_ref[0]                                            # (S, D) carried activation

    # Additive key-mask bias built in-kernel from the (1, S) pad mask (VPU slot).
    key_bias = jnp.where(mask_ref[0] == 0.0, -1e9, 0.0)      # (1, S)

    # ---------------- Multi-head self-attention ----------------
    residual = x
    xn = _layer_norm(x, ln1_g[0], ln1_b[0], 1e-6)             # LN eps = 1e-6

    # Fused Q|K|V projection: ONE lane-dense (S, D) @ (D, 128) MXU push.
    # (wq pre-scaled by 1/sqrt(dk) on the host; padded columns are zero.)
    qkv = (jnp.dot(xn.astype(mdt), wqkv[0], preferred_element_type=jnp.float32)
           + bqkv[0])                                          # (S, qkv_pad)

    q_off, k_off, v_off = 0, H * dk, 2 * H * dk
    for h in range(H):   # unrolled; the score/context dots are intrinsically per-head
        q_h = qkv[:, q_off + h * dk: q_off + (h + 1) * dk].astype(mdt)   # (S, dk)
        k_h = qkv[:, k_off + h * dk: k_off + (h + 1) * dk].astype(mdt)   # (S, dk)
        v_h = qkv[:, v_off + h * dv: v_off + (h + 1) * dv].astype(mdt)   # (S, dv)
        s = jax.lax.dot_general(q_h, k_h, (((1,), (1,)), ((), ())),
                                preferred_element_type=jnp.float32) + key_bias
        m = jnp.max(s, axis=-1, keepdims=True)
        e = jnp.exp(s - m)
        p = e * pl.reciprocal(jnp.sum(e, axis=-1, keepdims=True), approx=True)
        ctx_buf[:, h * dv:(h + 1) * dv] = jnp.dot(
            p.astype(mdt), v_h, preferred_element_type=jnp.float32)

    # Fused output projection: single (S, H*dv) @ (H*dv, D) dot, no per-head sum.
    attn = (jnp.dot(ctx_buf[...].astype(mdt), wo[0],
                    preferred_element_type=jnp.float32) + bo[0])
    # TODO(synk): attention / projection dropout omitted (eval-mode identity).
    x = attn + residual

    # ---------------- MLP bottleneck ----------------
    residual = x
    xn = _layer_norm(x, ln2_g[0], ln2_b[0], 1e-5)              # default LN eps
    h1 = jnp.maximum(
        jnp.dot(xn.astype(mdt), w1[0], preferred_element_type=jnp.float32) + b1[0],
        0.0)
    out_ref[0] = (jnp.dot(h1.astype(mdt), w2[0], preferred_element_type=jnp.float32)
                  + b2[0] + residual)


# ----------------------------------------------------------------------------
# Host-side parameter re-layout (per layer, PyTorch-natural shapes in).
# ----------------------------------------------------------------------------
def _prep_layer_params(params, n_heads, d_key, d_value, qkv_pad, matmul_dtype):
    (ln1_g, ln1_b, wq, bq, wk, bk, wv, bv, wo, bo,
     ln2_g, ln2_b, w1, b1, w2, b2) = params
    d_in = wq.shape[0]
    inv_t = 1.0 / (d_key ** 0.5)          # fold softmax temperature into W_q / b_q

    # Fused [Q | K | V | zero-pad] weight, padded to a lane-dense width.
    wqkv = jnp.concatenate([wq * inv_t, wk, wv], axis=1)       # (D, H*(2dk+dv))
    bqkv = jnp.concatenate([bq * inv_t, bk, bv], axis=0)
    pad = qkv_pad - wqkv.shape[1]
    wqkv = jnp.pad(wqkv, ((0, 0), (0, pad)))
    bqkv = jnp.pad(bqkv, (0, pad))

    f32 = jnp.float32
    mdt = matmul_dtype
    return (
        ln1_g.reshape(1, d_in).astype(f32), ln1_b.reshape(1, d_in).astype(f32),
        wqkv.astype(mdt), bqkv.reshape(1, -1).astype(f32),
        wo.astype(mdt),                    # (H*dv, D), PyTorch-natural layout
        bo.reshape(1, d_in).astype(f32),
        ln2_g.reshape(1, d_in).astype(f32), ln2_b.reshape(1, d_in).astype(f32),
        w1.astype(mdt), b1.reshape(1, -1).astype(f32),
        w2.astype(mdt), b2.reshape(1, d_in).astype(f32),
    )


# ----------------------------------------------------------------------------
# Wrapper: whole stack in one pallas_call; grid = (batch, n_layers)
# ----------------------------------------------------------------------------
def transformer_forward(x, mask, layer_params, *, n_heads, d_key, d_value,
                        matmul_dtype=jnp.float32):
    """x: (B, S, D) f32, mask: (B, 1, S) f32 (1 = keep, 0 = pad)."""
    B, S, D = x.shape
    L = len(layer_params)
    qkv_width = n_heads * (2 * d_key + d_value)
    qkv_pad = 128 * pl.cdiv(qkv_width, 128)   # lane-dense fused QKV width

    prepped = [_prep_layer_params(p, n_heads, d_key, d_value, qkv_pad, matmul_dtype)
               for p in layer_params]
    stacked = [jnp.stack(arrs, axis=0) for arrs in zip(*prepped)]  # leading layer axis

    kernel = functools.partial(
        _fused_transformer_kernel,
        n_heads=n_heads, d_key=d_key, d_value=d_value, matmul_dtype=matmul_dtype)

    def _layer_spec(p):
        nz = (0,) * (p.ndim - 1)
        return pl.BlockSpec((1,) + p.shape[1:], lambda b, l, nz=nz: (l,) + nz)

    in_specs = [
        pl.BlockSpec((1, S, D), lambda b, l: (b, 0, 0)),   # input activations
        pl.BlockSpec((1, 1, S), lambda b, l: (b, 0, 0)),   # per-row key pad mask
    ] + [_layer_spec(p) for p in stacked]

    out = pl.pallas_call(
        kernel,
        out_shape=jax.ShapeDtypeStruct((B, S, D), jnp.float32),
        grid=(B, L),
        in_specs=in_specs,
        # Output block index depends only on the batch coord => the activation
        # stays resident in VMEM across the whole layer axis; HBM writeback
        # happens once per batch row, after the last layer.
        out_specs=pl.BlockSpec((1, S, D), lambda b, l: (b, 0, 0)),
        scratch_shapes=[pltpu.VMEM((S, n_heads * d_value), jnp.float32)],
        compiler_params=pltpu.CompilerParams(
            # batch rows are independent (megacore on v7x); layers are sequential.
            dimension_semantics=("parallel", "arbitrary")),
        # TODO(synk): at production d_model set vmem_limit_bytes explicitly and
        # split the layer into attention/MLP grid steps to fit v7x's 64 MiB VMEM.
    )(x, mask.astype(jnp.float32), *stacked)
    return out


# ----------------------------------------------------------------------------
# Deterministic parameter construction (PyTorch-natural shapes)
# ----------------------------------------------------------------------------
def init_layer_params(key, d_input, n_heads, d_key, d_value, d_bottleneck):
    ks = jax.random.split(key, 8)
    scale = 0.05
    ln1_g = jnp.ones((d_input,), jnp.float32)
    ln1_b = jnp.zeros((d_input,), jnp.float32)
    wq = scale * jax.random.normal(ks[0], (d_input, n_heads * d_key), jnp.float32)
    bq = scale * jax.random.normal(ks[1], (n_heads * d_key,), jnp.float32)
    wk = scale * jax.random.normal(ks[2], (d_input, n_heads * d_key), jnp.float32)
    bk = jnp.zeros((n_heads * d_key,), jnp.float32)
    wv = scale * jax.random.normal(ks[3], (d_input, n_heads * d_value), jnp.float32)
    bv = jnp.zeros((n_heads * d_value,), jnp.float32)
    wo = scale * jax.random.normal(ks[4], (n_heads * d_value, d_input), jnp.float32)
    bo = jnp.zeros((d_input,), jnp.float32)
    ln2_g = jnp.ones((d_input,), jnp.float32)
    ln2_b = jnp.zeros((d_input,), jnp.float32)
    w1 = scale * jax.random.normal(ks[5], (d_input, d_bottleneck), jnp.float32)
    b1 = scale * jax.random.normal(ks[6], (d_bottleneck,), jnp.float32)
    w2 = scale * jax.random.normal(ks[7], (d_bottleneck, d_input), jnp.float32)
    b2 = jnp.zeros((d_input,), jnp.float32)
    return (ln1_g, ln1_b, wq, bq, wk, bk, wv, bv, wo, bo,
            ln2_g, ln2_b, w1, b1, w2, b2)


# ----------------------------------------------------------------------------
# Pure-JAX reference (mirrors the PyTorch forward, dropout = identity)
# ----------------------------------------------------------------------------
def reference_layer(x, mask, params, *, n_heads, d_key, d_value):
    (ln1_g, ln1_b, wq, bq, wk, bk, wv, bv, wo, bo,
     ln2_g, ln2_b, w1, b1, w2, b2) = params
    B, S, D = x.shape
    residual = x
    mu = x.mean(-1, keepdims=True)
    var = ((x - mu) ** 2).mean(-1, keepdims=True)
    xn = (x - mu) / jnp.sqrt(var + 1e-6) * ln1_g + ln1_b
    q = (xn @ wq + bq).reshape(B, S, n_heads, d_key).transpose(0, 2, 1, 3)
    k = (xn @ wk + bk).reshape(B, S, n_heads, d_key).transpose(0, 2, 1, 3)
    v = (xn @ wv + bv).reshape(B, S, n_heads, d_value).transpose(0, 2, 1, 3)
    scores = jnp.einsum("bhqd,bhkd->bhqk", q / (d_key ** 0.5), k)
    scores = jnp.where(mask[:, :, None, :] == 0, -1e9, scores)
    attn = jax.nn.softmax(scores, axis=-1)
    hidden = jnp.einsum("bhqk,bhkd->bhqd", attn, v)
    hidden = hidden.transpose(0, 2, 1, 3).reshape(B, S, n_heads * d_value)
    x = hidden @ wo + bo + residual
    residual = x
    mu = x.mean(-1, keepdims=True)
    var = ((x - mu) ** 2).mean(-1, keepdims=True)
    xn = (x - mu) / jnp.sqrt(var + 1e-5) * ln2_g + ln2_b
    h1 = jnp.maximum(xn @ w1 + b1, 0.0)
    return h1 @ w2 + b2 + residual


if __name__ == "__main__":
    # Small config consistent with the module: n_layers=2, n_heads=4,
    # d_input=32, d_key=d_value=8, d_bottleneck=64, batch=2, seq=8.
    n_layers, n_heads = 2, 4
    d_input, d_key, d_value, d_bottleneck = 32, 8, 8, 64
    B, S = 2, 8

    root = jax.random.PRNGKey(0)
    kx, kp = jax.random.split(root)
    x = jax.random.normal(kx, (B, S, d_input), jnp.float32)

    lengths = jnp.array([S, 5], jnp.int32)
    mask = (jnp.arange(S)[None, :] < lengths[:, None]).astype(jnp.float32)
    mask = mask.reshape(B, 1, S)

    layer_keys = jax.random.split(kp, n_layers)
    layer_params = [
        init_layer_params(k, d_input, n_heads, d_key, d_value, d_bottleneck)
        for k in layer_keys
    ]

    # Pure-JAX reference.
    ref = x
    for params in layer_params:
        ref = reference_layer(ref, mask, params,
                              n_heads=n_heads, d_key=d_key, d_value=d_value)
    ref = np.asarray(ref)

    # f32 MXU operands: tight check (covers default-precision matmuls, the
    # host-folded 1/sqrt(d_key), and the approximate softmax reciprocal).
    out_f32 = jax.block_until_ready(
        transformer_forward(x, mask, layer_params, n_heads=n_heads,
                            d_key=d_key, d_value=d_value,
                            matmul_dtype=jnp.float32))
    np.testing.assert_allclose(np.asarray(out_f32), ref, rtol=5e-3, atol=5e-3)

    # bf16 MXU operands (production dtype on v6e/v7x; f32 accumulation): looser check.
    out_bf16 = jax.block_until_ready(
        transformer_forward(x, mask, layer_params, n_heads=n_heads,
                            d_key=d_key, d_value=d_value,
                            matmul_dtype=jnp.bfloat16))
    np.testing.assert_allclose(np.asarray(out_bf16), ref, rtol=3e-2, atol=3e-2)

    print("KERNEL_OK")
</pallas_src>

<mosaic_0001>
module attributes {stable_mosaic.version = 11 : i64} {
  func.func @_fused_transformer_kernel(%arg0: i32, %arg1: i32, %arg2: memref<1x8x32xf32, #tpu.memory_space<vmem>>, %arg3: memref<1x1x8xf32, #tpu.memory_space<vmem>>, %arg4: memref<1x1x32xf32, #tpu.memory_space<vmem>>, %arg5: memref<1x1x32xf32, #tpu.memory_space<vmem>>, %arg6: memref<1x32x128xf32, #tpu.memory_space<vmem>>, %arg7: memref<1x1x128xf32, #tpu.memory_space<vmem>>, %arg8: memref<1x32x32xf32, #tpu.memory_space<vmem>>, %arg9: memref<1x1x32xf32, #tpu.memory_space<vmem>>, %arg10: memref<1x1x32xf32, #tpu.memory_space<vmem>>, %arg11: memref<1x1x32xf32, #tpu.memory_space<vmem>>, %arg12: memref<1x32x64xf32, #tpu.memory_space<vmem>>, %arg13: memref<1x1x64xf32, #tpu.memory_space<vmem>>, %arg14: memref<1x64x32xf32, #tpu.memory_space<vmem>>, %arg15: memref<1x1x32xf32, #tpu.memory_space<vmem>>, %arg16: memref<1x8x32xf32, #tpu.memory_space<vmem>>, %arg17: memref<8x32xf32, #tpu.memory_space<vmem>>) attributes {dimension_semantics = [#tpu.dimension_semantics<parallel>, #tpu.dimension_semantics<arbitrary>], iteration_bounds = array<i64: 2, 2>, scalar_prefetch = 0 : i64, scratch_operands = 1 : i64, tpu.core_type = #tpu.core_type<tc>, window_params = [{transform_indices = @transform_0, window_bounds = array<i64: 1, 8, 32>}, {transform_indices = @transform_1, window_bounds = array<i64: 1, 1, 8>}, {transform_indices = @transform_2, window_bounds = array<i64: 1, 1, 32>}, {transform_indices = @transform_3, window_bounds = array<i64: 1, 1, 32>}, {transform_indices = @transform_4, window_bounds = array<i64: 1, 32, 128>}, {transform_indices = @transform_5, window_bounds = array<i64: 1, 1, 128>}, {transform_indices = @transform_6, window_bounds = array<i64: 1, 32, 32>}, {transform_indices = @transform_7, window_bounds = array<i64: 1, 1, 32>}, {transform_indices = @transform_8, window_bounds = array<i64: 1, 1, 32>}, {transform_indices = @transform_9, window_bounds = array<i64: 1, 1, 32>}, {transform_indices = @transform_10, window_bounds = array<i64: 1, 32, 64>}, {transform_indices = @transform_11, window_bounds = array<i64: 1, 1, 64>}, {transform_indices = @transform_12, window_bounds = array<i64: 1, 64, 32>}, {transform_indices = @transform_13, window_bounds = array<i64: 1, 1, 32>}, {transform_indices = @transform_14, window_bounds = array<i64: 1, 8, 32>}]} {
    %c0_i32 = arith.constant 0 : i32
    %0 = arith.cmpi eq, %arg1, %c0_i32 : i32
    %1 = arith.extui %0 : i1 to i32
    %c0_i32_0 = arith.constant 0 : i32
    %2 = arith.cmpi ne, %1, %c0_i32_0 : i32
    scf.if %2 {
      %c0_85 = arith.constant 0 : index
      %c0_86 = arith.constant 0 : index
      %c0_87 = arith.constant 0 : index
      %172 = vector.load %arg2[%c0_85, %c0_86, %c0_87] : memref<1x8x32xf32, #tpu.memory_space<vmem>>, vector<1x8x32xf32>
      %c0_88 = arith.constant 0 : index
      %c0_89 = arith.constant 0 : index
      %c0_90 = arith.constant 0 : index
      %173 = vector.load %arg16[%c0_88, %c0_89, %c0_90] : memref<1x8x32xf32, #tpu.memory_space<vmem>>, vector<1x8x32xf32>
      tpu.vector_store %arg16[%c0_88, %c0_89, %c0_90], %172 {strides = array<i32>} : memref<1x8x32xf32, #tpu.memory_space<vmem>>, vector<1x8x32xf32>,
    } else {
    }
    %c0 = arith.constant 0 : index
    %c0_1 = arith.constant 0 : index
    %c0_2 = arith.constant 0 : index
    %3 = vector.load %arg16[%c0, %c0_1, %c0_2] : memref<1x8x32xf32, #tpu.memory_space<vmem>>, vector<1x8x32xf32>
    %4 = vector.shape_cast %3 : vector<1x8x32xf32> to vector<8x32xf32>
    %c0_3 = arith.constant 0 : index
    %c0_4 = arith.constant 0 : index
    %c0_5 = arith.constant 0 : index
    %5 = vector.load %arg3[%c0_3, %c0_4, %c0_5] : memref<1x1x8xf32, #tpu.memory_space<vmem>>, vector<1x1x8xf32>
    %6 = vector.shape_cast %5 : vector<1x1x8xf32> to vector<1x8xf32>
    %cst = arith.constant 0.000000e+00 : f32
    %7 = vector.broadcast %cst : f32 to vector<1x8xf32>
    %8 = arith.cmpf oeq, %6, %7 : vector<1x8xf32>
    %cst_6 = arith.constant -1.000000e+09 : f32
    %cst_7 = arith.constant 0.000000e+00 : f32
    %9 = vector.broadcast %cst_6 : f32 to vector<1x8xf32>
    %10 = vector.broadcast %cst_7 : f32 to vector<1x8xf32>
    %11 = arith.select %8, %9, %10 : vector<1x8xi1>, vector<1x8xf32>
    %c0_8 = arith.constant 0 : index
    %c0_9 = arith.constant 0 : index
    %c0_10 = arith.constant 0 : index
    %12 = vector.load %arg4[%c0_8, %c0_9, %c0_10] : memref<1x1x32xf32, #tpu.memory_space<vmem>>, vector<1x1x32xf32>
    %13 = vector.shape_cast %12 : vector<1x1x32xf32> to vector<1x32xf32>
    %c0_11 = arith.constant 0 : index
    %c0_12 = arith.constant 0 : index
    %c0_13 = arith.constant 0 : index
    %14 = vector.load %arg5[%c0_11, %c0_12, %c0_13] : memref<1x1x32xf32, #tpu.memory_space<vmem>>, vector<1x1x32xf32>
    %15 = vector.shape_cast %14 : vector<1x1x32xf32> to vector<1x32xf32>
    %cst_14 = arith.constant dense<0.000000e+00> : vector<8xf32>
    %16 = vector.multi_reduction <add>, %4, %cst_14 [1] : vector<8x32xf32> to vector<8xf32>
    %17 = vector.shape_cast %16 : vector<8xf32> to vector<8x1xf32>
    %cst_15 = arith.constant 3.200000e+01 : f32
    %18 = vector.broadcast %cst_15 : f32 to vector<8x1xf32>
    %19 = arith.divf %17, %18 : vector<8x1xf32>
    %20 = arith.mulf %4, %4 : vector<8x32xf32>
    %cst_16 = arith.constant dense<0.000000e+00> : vector<8xf32>
    %21 = vector.multi_reduction <add>, %20, %cst_16 [1] : vector<8x32xf32> to vector<8xf32>
    %22 = vector.shape_cast %21 : vector<8xf32> to vector<8x1xf32>
    %cst_17 = arith.constant 3.200000e+01 : f32
    %23 = vector.broadcast %cst_17 : f32 to vector<8x1xf32>
    %24 = arith.divf %22, %23 : vector<8x1xf32>
    %25 = arith.mulf %19, %19 : vector<8x1xf32>
    %26 = arith.subf %24, %25 : vector<8x1xf32>
    %27 = vector.broadcast %19 : vector<8x1xf32> to vector<8x32xf32>
    %28 = arith.subf %4, %27 : vector<8x32xf32>
    %cst_18 = arith.constant 9.99999997E-7 : f32
    %29 = vector.broadcast %cst_18 : f32 to vector<8x1xf32>
    %30 = arith.addf %26, %29 : vector<8x1xf32>
    %31 = math.rsqrt %30 : vector<8x1xf32>
    %32 = vector.broadcast %31 : vector<8x1xf32> to vector<8x32xf32>
    %33 = arith.mulf %28, %32 : vector<8x32xf32>
    %34 = vector.broadcast %13 : vector<1x32xf32> to vector<8x32xf32>
    %35 = arith.mulf %33, %34 : vector<8x32xf32>
    %36 = vector.broadcast %15 : vector<1x32xf32> to vector<8x32xf32>
    %37 = arith.addf %35, %36 : vector<8x32xf32>
    %c0_19 = arith.constant 0 : index
    %c0_20 = arith.constant 0 : index
    %c0_21 = arith.constant 0 : index
    %38 = vector.load %arg6[%c0_19, %c0_20, %c0_21] : memref<1x32x128xf32, #tpu.memory_space<vmem>>, vector<1x32x128xf32>
    %39 = vector.shape_cast %38 : vector<1x32x128xf32> to vector<32x128xf32>
    %cst_22 = arith.constant dense<0.000000e+00> : vector<8x128xf32>
    %40 = tpu.matmul %37, %39, %cst_22 {dimension_numbers = #tpu.dot_dimension_numbers<[1], [0], [0], [1], [0, 0, 1, 1], [], []>} : vector<8x32xf32>, vector<32x128xf32>, vector<8x128xf32> -> vector<8x128xf32>
    %c0_23 = arith.constant 0 : index
    %c0_24 = arith.constant 0 : index
    %c0_25 = arith.constant 0 : index
    %41 = vector.load %arg7[%c0_23, %c0_24, %c0_25] : memref<1x1x128xf32, #tpu.memory_space<vmem>>, vector<1x1x128xf32>
    %42 = vector.shape_cast %41 : vector<1x1x128xf32> to vector<1x128xf32>
    %43 = vector.broadcast %42 : vector<1x128xf32> to vector<8x128xf32>
    %44 = arith.addf %40, %43 : vector<8x128xf32>
    %45 = vector.extract_strided_slice %44 {offsets = [0, 0], sizes = [8, 8], strides = [1, 1]} : vector<8x128xf32> to vector<8x8xf32>
    %46 = vector.extract_strided_slice %44 {offsets = [0, 32], sizes = [8, 8], strides = [1, 1]} : vector<8x128xf32> to vector<8x8xf32>
    %47 = vector.extract_strided_slice %44 {offsets = [0, 64], sizes = [8, 8], strides = [1, 1]} : vector<8x128xf32> to vector<8x8xf32>
    %cst_26 = arith.constant dense<0.000000e+00> : vector<8x8xf32>
    %48 = tpu.matmul %45, %46, %cst_26 {dimension_numbers = #tpu.dot_dimension_numbers<[1], [1], [0], [0], [0, 0, 1, 0], [], []>} : vector<8x8xf32>, vector<8x8xf32>, vector<8x8xf32> -> vector<8x8xf32>
    %49 = vector.broadcast %11 : vector<1x8xf32> to vector<8x8xf32>
    %50 = arith.addf %48, %49 : vector<8x8xf32>
    %cst_27 = arith.constant dense<0xFF800000> : vector<8xf32>
    %51 = vector.multi_reduction <maximumf>, %50, %cst_27 [1] : vector<8x8xf32> to vector<8xf32>
    %52 = vector.shape_cast %51 : vector<8xf32> to vector<8x1xf32>
    %53 = vector.broadcast %52 : vector<8x1xf32> to vector<8x8xf32>
    %54 = arith.subf %50, %53 : vector<8x8xf32>
    %55 = math.exp %54 : vector<8x8xf32>
    %cst_28 = arith.constant dense<0.000000e+00> : vector<8xf32>
    %56 = vector.multi_reduction <add>, %55, %cst_28 [1] : vector<8x8xf32> to vector<8xf32>
    %57 = vector.shape_cast %56 : vector<8xf32> to vector<8x1xf32>
    %58 = tpu.reciprocal %57 {approx = true} : vector<8x1xf32> -> vector<8x1xf32>
    %59 = vector.broadcast %58 : vector<8x1xf32> to vector<8x8xf32>
    %60 = arith.mulf %55, %59 : vector<8x8xf32>
    %cst_29 = arith.constant dense<0.000000e+00> : vector<8x8xf32>
    %61 = tpu.matmul %60, %47, %cst_29 {dimension_numbers = #tpu.dot_dimension_numbers<[1], [0], [0], [1], [0, 0, 1, 1], [], []>} : vector<8x8xf32>, vector<8x8xf32>, vector<8x8xf32> -> vector<8x8xf32>
    %c0_30 = arith.constant 0 : index
    %c0_31 = arith.constant 0 : index
    %62 = vector.load %arg17[%c0_30, %c0_31] : memref<8x32xf32, #tpu.memory_space<vmem>>, vector<8x8xf32>
    tpu.vector_store %arg17[%c0_30, %c0_31], %61 {strides = array<i32>} : memref<8x32xf32, #tpu.memory_space<vmem>>, vector<8x8xf32>,
    %63 = vector.extract_strided_slice %44 {offsets = [0, 8], sizes = [8, 8], strides = [1, 1]} : vector<8x128xf32> to vector<8x8xf32>
    %64 = vector.extract_strided_slice %44 {offsets = [0, 40], sizes = [8, 8], strides = [1, 1]} : vector<8x128xf32> to vector<8x8xf32>
    %65 = vector.extract_strided_slice %44 {offsets = [0, 72], sizes = [8, 8], strides = [1, 1]} : vector<8x128xf32> to vector<8x8xf32>
    %cst_32 = arith.constant dense<0.000000e+00> : vector<8x8xf32>
    %66 = tpu.matmul %63, %64, %cst_32 {dimension_numbers = #tpu.dot_dimension_numbers<[1], [1], [0], [0], [0, 0, 1, 0], [], []>} : vector<8x8xf32>, vector<8x8xf32>, vector<8x8xf32> -> vector<8x8xf32>
    %67 = vector.broadcast %11 : vector<1x8xf32> to vector<8x8xf32>
    %68 = arith.addf %66, %67 : vector<8x8xf32>
    %cst_33 = arith.constant dense<0xFF800000> : vector<8xf32>
    %69 = vector.multi_reduction <maximumf>, %68, %cst_33 [1] : vector<8x8xf32> to vector<8xf32>
    %70 = vector.shape_cast %69 : vector<8xf32> to vector<8x1xf32>
    %71 = vector.broadcast %70 : vector<8x1xf32> to vector<8x8xf32>
    %72 = arith.subf %68, %71 : vector<8x8xf32>
    %73 = math.exp %72 : vector<8x8xf32>
    %cst_34 = arith.constant dense<0.000000e+00> : vector<8xf32>
    %74 = vector.multi_reduction <add>, %73, %cst_34 [1] : vector<8x8xf32> to vector<8xf32>
    %75 = vector.shape_cast %74 : vector<8xf32> to vector<8x1xf32>
    %76 = tpu.reciprocal %75 {approx = true} : vector<8x1xf32> -> vector<8x1xf32>
    %77 = vector.broadcast %76 : vector<8x1xf32> to vector<8x8xf32>
    %78 = arith.mulf %73, %77 : vector<8x8xf32>
    %cst_35 = arith.constant dense<0.000000e+00> : vector<8x8xf32>
    %79 = tpu.matmul %78, %65, %cst_35 {dimension_numbers = #tpu.dot_dimension_numbers<[1], [0], [0], [1], [0, 0, 1, 1], [], []>} : vector<8x8xf32>, vector<8x8xf32>, vector<8x8xf32> -> vector<8x8xf32>
    %c0_36 = arith.constant 0 : index
    %c8 = arith.constant 8 : index
    %80 = vector.load %arg17[%c0_36, %c8] : memref<8x32xf32, #tpu.memory_space<vmem>>, vector<8x8xf32>
    tpu.vector_store %arg17[%c0_36, %c8], %79 {strides = array<i32>} : memref<8x32xf32, #tpu.memory_space<vmem>>, vector<8x8xf32>,
    %81 = vector.extract_strided_slice %44 {offsets = [0, 16], sizes = [8, 8], strides = [1, 1]} : vector<8x128xf32> to vector<8x8xf32>
    %82 = vector.extract_strided_slice %44 {offsets = [0, 48], sizes = [8, 8], strides = [1, 1]} : vector<8x128xf32> to vector<8x8xf32>
    %83 = vector.extract_strided_slice %44 {offsets = [0, 80], sizes = [8, 8], strides = [1, 1]} : vector<8x128xf32> to vector<8x8xf32>
    %cst_37 = arith.constant dense<0.000000e+00> : vector<8x8xf32>
    %84 = tpu.matmul %81, %82, %cst_37 {dimension_numbers = #tpu.dot_dimension_numbers<[1], [1], [0], [0], [0, 0, 1, 0], [], []>} : vector<8x8xf32>, vector<8x8xf32>, vector<8x8xf32> -> vector<8x8xf32>
    %85 = vector.broadcast %11 : vector<1x8xf32> to vector<8x8xf32>
    %86 = arith.addf %84, %85 : vector<8x8xf32>
    %cst_38 = arith.constant dense<0xFF800000> : vector<8xf32>
    %87 = vector.multi_reduction <maximumf>, %86, %cst_38 [1] : vector<8x8xf32> to vector<8xf32>
    %88 = vector.shape_cast %87 : vector<8xf32> to vector<8x1xf32>
    %89 = vector.broadcast %88 : vector<8x1xf32> to vector<8x8xf32>
    %90 = arith.subf %86, %89 : vector<8x8xf32>
    %91 = math.exp %90 : vector<8x8xf32>
    %cst_39 = arith.constant dense<0.000000e+00> : vector<8xf32>
    %92 = vector.multi_reduction <add>, %91, %cst_39 [1] : vector<8x8xf32> to vector<8xf32>
    %93 = vector.shape_cast %92 : vector<8xf32> to vector<8x1xf32>
    %94 = tpu.reciprocal %93 {approx = true} : vector<8x1xf32> -> vector<8x1xf32>
    %95 = vector.broadcast %94 : vector<8x1xf32> to vector<8x8xf32>
    %96 = arith.mulf %91, %95 : vector<8x8xf32>
    %cst_40 = arith.constant dense<0.000000e+00> : vector<8x8xf32>
    %97 = tpu.matmul %96, %83, %cst_40 {dimension_numbers = #tpu.dot_dimension_numbers<[1], [0], [0], [1], [0, 0, 1, 1], [], []>} : vector<8x8xf32>, vector<8x8xf32>, vector<8x8xf32> -> vector<8x8xf32>
    %c0_41 = arith.constant 0 : index
    %c16 = arith.constant 16 : index
    %98 = vector.load %arg17[%c0_41, %c16] : memref<8x32xf32, #tpu.memory_space<vmem>>, vector<8x8xf32>
    tpu.vector_store %arg17[%c0_41, %c16], %97 {strides = array<i32>} : memref<8x32xf32, #tpu.memory_space<vmem>>, vector<8x8xf32>,
    %99 = vector.extract_strided_slice %44 {offsets = [0, 24], sizes = [8, 8], strides = [1, 1]} : vector<8x128xf32> to vector<8x8xf32>
    %100 = vector.extract_strided_slice %44 {offsets = [0, 56], sizes = [8, 8], strides = [1, 1]} : vector<8x128xf32> to vector<8x8xf32>
    %101 = vector.extract_strided_slice %44 {offsets = [0, 88], sizes = [8, 8], strides = [1, 1]} : vector<8x128xf32> to vector<8x8xf32>
    %cst_42 = arith.constant dense<0.000000e+00> : vector<8x8xf32>
    %102 = tpu.matmul %99, %100, %cst_42 {dimension_numbers = #tpu.dot_dimension_numbers<[1], [1], [0], [0], [0, 0, 1, 0], [], []>} : vector<8x8xf32>, vector<8x8xf32>, vector<8x8xf32> -> vector<8x8xf32>
    %103 = vector.broadcast %11 : vector<1x8xf32> to vector<8x8xf32>
    %104 = arith.addf %102, %103 : vector<8x8xf32>
    %cst_43 = arith.constant dense<0xFF800000> : vector<8xf32>
    %105 = vector.multi_reduction <maximumf>, %104, %cst_43 [1] : vector<8x8xf32> to vector<8xf32>
    %106 = vector.shape_cast %105 : vector<8xf32> to vector<8x1xf32>
    %107 = vector.broadcast %106 : vector<8x1xf32> to vector<8x8xf32>
    %108 = arith.subf %104, %107 : vector<8x8xf32>
    %109 = math.exp %108 : vector<8x8xf32>
    %cst_44 = arith.constant dense<0.000000e+00> : vector<8xf32>
    %110 = vector.multi_reduction <add>, %109, %cst_44 [1] : vector<8x8xf32> to vector<8xf32>
    %111 = vector.shape_cast %110 : vector<8xf32> to vector<8x1xf32>
    %112 = tpu.reciprocal %111 {approx = true} : vector<8x1xf32> -> vector<8x1xf32>
    %113 = vector.broadcast %112 : vector<8x1xf32> to vector<8x8xf32>
    %114 = arith.mulf %109, %113 : vector<8x8xf32>
    %cst_45 = arith.constant dense<0.000000e+00> : vector<8x8xf32>
    %115 = tpu.matmul %114, %101, %cst_45 {dimension_numbers = #tpu.dot_dimension_numbers<[1], [0], [0], [1], [0, 0, 1, 1], [], []>} : vector<8x8xf32>, vector<8x8xf32>, vector<8x8xf32> -> vector<8x8xf32>
    %c0_46 = arith.constant 0 : index
    %c24 = arith.constant 24 : index
    %116 = vector.load %arg17[%c0_46, %c24] : memref<8x32xf32, #tpu.memory_space<vmem>>, vector<8x8xf32>
    tpu.vector_store %arg17[%c0_46, %c24], %115 {strides = array<i32>} : memref<8x32xf32, #tpu.memory_space<vmem>>, vector<8x8xf32>,
    %c0_47 = arith.constant 0 : index
    %c0_48 = arith.constant 0 : index
    %117 = vector.load %arg17[%c0_47, %c0_48] : memref<8x32xf32, #tpu.memory_space<vmem>>, vector<8x32xf32>
    %c0_49 = arith.constant 0 : index
    %c0_50 = arith.constant 0 : index
    %c0_51 = arith.constant 0 : index
    %118 = vector.load %arg8[%c0_49, %c0_50, %c0_51] : memref<1x32x32xf32, #tpu.memory_space<vmem>>, vector<1x32x32xf32>
    %119 = vector.shape_cast %118 : vector<1x32x32xf32> to vector<32x32xf32>
    %cst_52 = arith.constant dense<0.000000e+00> : vector<8x32xf32>
    %120 = tpu.matmul %117, %119, %cst_52 {dimension_numbers = #tpu.dot_dimension_numbers<[1], [0], [0], [1], [0, 0, 1, 1], [], []>} : vector<8x32xf32>, vector<32x32xf32>, vector<8x32xf32> -> vector<8x32xf32>
    %c0_53 = arith.constant 0 : index
    %c0_54 = arith.constant 0 : index
    %c0_55 = arith.constant 0 : index
    %121 = vector.load %arg9[%c0_53, %c0_54, %c0_55] : memref<1x1x32xf32, #tpu.memory_space<vmem>>, vector<1x1x32xf32>
    %122 = vector.shape_cast %121 : vector<1x1x32xf32> to vector<1x32xf32>
    %123 = vector.broadcast %122 : vector<1x32xf32> to vector<8x32xf32>
    %124 = arith.addf %120, %123 : vector<8x32xf32>
    %125 = arith.addf %124, %4 : vector<8x32xf32>
    %c0_56 = arith.constant 0 : index
    %c0_57 = arith.constant 0 : index
    %c0_58 = arith.constant 0 : index
    %126 = vector.load %arg10[%c0_56, %c0_57, %c0_58] : memref<1x1x32xf32, #tpu.memory_space<vmem>>, vector<1x1x32xf32>
    %127 = vector.shape_cast %126 : vector<1x1x32xf32> to vector<1x32xf32>
    %c0_59 = arith.constant 0 : index
    %c0_60 = arith.constant 0 : index
    %c0_61 = arith.constant 0 : index
    %128 = vector.load %arg11[%c0_59, %c0_60, %c0_61] : memref<1x1x32xf32, #tpu.memory_space<vmem>>, vector<1x1x32xf32>
    %129 = vector.shape_cast %128 : vector<1x1x32xf32> to vector<1x32xf32>
    %cst_62 = arith.constant dense<0.000000e+00> : vector<8xf32>
    %130 = vector.multi_reduction <add>, %125, %cst_62 [1] : vector<8x32xf32> to vector<8xf32>
    %131 = vector.shape_cast %130 : vector<8xf32> to vector<8x1xf32>
    %cst_63 = arith.constant 3.200000e+01 : f32
    %132 = vector.broadcast %cst_63 : f32 to vector<8x1xf32>
    %133 = arith.divf %131, %132 : vector<8x1xf32>
    %134 = arith.mulf %125, %125 : vector<8x32xf32>
    %cst_64 = arith.constant dense<0.000000e+00> : vector<8xf32>
    %135 = vector.multi_reduction <add>, %134, %cst_64 [1] : vector<8x32xf32> to vector<8xf32>
    %136 = vector.shape_cast %135 : vector<8xf32> to vector<8x1xf32>
    %cst_65 = arith.constant 3.200000e+01 : f32
    %137 = vector.broadcast %cst_65 : f32 to vector<8x1xf32>
    %138 = arith.divf %136, %137 : vector<8x1xf32>
    %139 = arith.mulf %133, %133 : vector<8x1xf32>
    %140 = arith.subf %138, %139 : vector<8x1xf32>
    %141 = vector.broadcast %133 : vector<8x1xf32> to vector<8x32xf32>
    %142 = arith.subf %125, %141 : vector<8x32xf32>
    %cst_66 = arith.constant 9.99999974E-6 : f32
    %143 = vector.broadcast %cst_66 : f32 to vector<8x1xf32>
    %144 = arith.addf %140, %143 : vector<8x1xf32>
    %145 = math.rsqrt %144 : vector<8x1xf32>
    %146 = vector.broadcast %145 : vector<8x1xf32> to vector<8x32xf32>
    %147 = arith.mulf %142, %146 : vector<8x32xf32>
    %148 = vector.broadcast %127 : vector<1x32xf32> to vector<8x32xf32>
    %149 = arith.mulf %147, %148 : vector<8x32xf32>
    %150 = vector.broadcast %129 : vector<1x32xf32> to vector<8x32xf32>
    %151 = arith.addf %149, %150 : vector<8x32xf32>
    %c0_67 = arith.constant 0 : index
    %c0_68 = arith.constant 0 : index
    %c0_69 = arith.constant 0 : index
    %152 = vector.load %arg12[%c0_67, %c0_68, %c0_69] : memref<1x32x64xf32, #tpu.memory_space<vmem>>, vector<1x32x64xf32>
    %153 = vector.shape_cast %152 : vector<1x32x64xf32> to vector<32x64xf32>
    %cst_70 = arith.constant dense<0.000000e+00> : vector<8x64xf32>
    %154 = tpu.matmul %151, %153, %cst_70 {dimension_numbers = #tpu.dot_dimension_numbers<[1], [0], [0], [1], [0, 0, 1, 1], [], []>} : vector<8x32xf32>, vector<32x64xf32>, vector<8x64xf32> -> vector<8x64xf32>
    %c0_71 = arith.constant 0 : index
    %c0_72 = arith.constant 0 : index
    %c0_73 = arith.constant 0 : index
    %155 = vector.load %arg13[%c0_71, %c0_72, %c0_73] : memref<1x1x64xf32, #tpu.memory_space<vmem>>, vector<1x1x64xf32>
    %156 = vector.shape_cast %155 : vector<1x1x64xf32> to vector<1x64xf32>
    %157 = vector.broadcast %156 : vector<1x64xf32> to vector<8x64xf32>
    %158 = arith.addf %154, %157 : vector<8x64xf32>
    %cst_74 = arith.constant 0.000000e+00 : f32
    %159 = vector.broadcast %cst_74 : f32 to vector<8x64xf32>
    %160 = arith.maximumf %158, %159 : vector<8x64xf32>
    %c0_75 = arith.constant 0 : index
    %c0_76 = arith.constant 0 : index
    %c0_77 = arith.constant 0 : index
    %161 = vector.load %arg14[%c0_75, %c0_76, %c0_77] : memref<1x64x32xf32, #tpu.memory_space<vmem>>, vector<1x64x32xf32>
    %162 = vector.shape_cast %161 : vector<1x64x32xf32> to vector<64x32xf32>
    %cst_78 = arith.constant dense<0.000000e+00> : vector<8x32xf32>
    %163 = tpu.matmul %160, %162, %cst_78 {dimension_numbers = #tpu.dot_dimension_numbers<[1], [0], [0], [1], [0, 0, 1, 1], [], []>} : vector<8x64xf32>, vector<64x32xf32>, vector<8x32xf32> -> vector<8x32xf32>
    %c0_79 = arith.constant 0 : index
    %c0_80 = arith.constant 0 : index
    %c0_81 = arith.constant 0 : index
    %164 = vector.load %arg15[%c0_79, %c0_80, %c0_81] : memref<1x1x32xf32, #tpu.memory_space<vmem>>, vector<1x1x32xf32>
    %165 = vector.shape_cast %164 : vector<1x1x32xf32> to vector<1x32xf32>
    %166 = vector.broadcast %165 : vector<1x32xf32> to vector<8x32xf32>
    %167 = arith.addf %163, %166 : vector<8x32xf32>
    %168 = arith.addf %167, %125 : vector<8x32xf32>
    %c0_82 = arith.constant 0 : index
    %c0_83 = arith.constant 0 : index
    %c0_84 = arith.constant 0 : index
    %169 = vector.load %arg16[%c0_82, %c0_83, %c0_84] : memref<1x8x32xf32, #tpu.memory_space<vmem>>, vector<1x8x32xf32>
    %170 = vector.shape_cast %169 : vector<1x8x32xf32> to vector<8x32xf32>
    %171 = vector.shape_cast %168 : vector<8x32xf32> to vector<1x8x32xf32>
    tpu.vector_store %arg16[%c0_82, %c0_83, %c0_84], %171 {strides = array<i32>} : memref<1x8x32xf32, #tpu.memory_space<vmem>>, vector<1x8x32xf32>,
    return
  }
  func.func @transform_0(%arg0: i32, %arg1: i32) -> (i32, i32, i32) {
    %c0_i32 = arith.constant 0 : i32
    %c0_i32_0 = arith.constant 0 : i32
    %c0_i32_1 = arith.constant 0 : i32
    return %arg0, %c0_i32, %c0_i32_0 : i32, i32, i32
  }
  func.func @transform_1(%arg0: i32, %arg1: i32) -> (i32, i32, i32) {
    %c0_i32 = arith.constant 0 : i32
    %c0_i32_0 = arith.constant 0 : i32
    %c0_i32_1 = arith.constant 0 : i32
    return %arg0, %c0_i32, %c0_i32_0 : i32, i32, i32
  }
  func.func @transform_2(%arg0: i32, %arg1: i32) -> (i32, i32, i32) {
    %c0_i32 = arith.constant 0 : i32
    %c0_i32_0 = arith.constant 0 : i32
    %c0_i32_1 = arith.constant 0 : i32
    return %arg1, %c0_i32, %c0_i32_0 : i32, i32, i32
  }
  func.func @transform_3(%arg0: i32, %arg1: i32) -> (i32, i32, i32) {
    %c0_i32 = arith.constant 0 : i32
    %c0_i32_0 = arith.constant 0 : i32
    %c0_i32_1 = arith.constant 0 : i32
    return %arg1, %c0_i32, %c0_i32_0 : i32, i32, i32
  }
  func.func @transform_4(%arg0: i32, %arg1: i32) -> (i32, i32, i32) {
    %c0_i32 = arith.constant 0 : i32
    %c0_i32_0 = arith.constant 0 : i32
    %c0_i32_1 = arith.constant 0 : i32
    return %arg1, %c0_i32, %c0_i32_0 : i32, i32, i32
  }
  func.func @transform_5(%arg0: i32, %arg1: i32) -> (i32, i32, i32) {
    %c0_i32 = arith.constant 0 : i32
    %c0_i32_0 = arith.constant 0 : i32
    %c0_i32_1 = arith.constant 0 : i32
    return %arg1, %c0_i32, %c0_i32_0 : i32, i32, i32
  }
  func.func @transform_6(%arg0: i32, %arg1: i32) -> (i32, i32, i32) {
    %c0_i32 = arith.constant 0 : i32
    %c0_i32_0 = arith.constant 0 : i32
    %c0_i32_1 = arith.constant 0 : i32
    return %arg1, %c0_i32, %c0_i32_0 : i32, i32, i32
  }
  func.func @transform_7(%arg0: i32, %arg1: i32) -> (i32, i32, i32) {
    %c0_i32 = arith.constant 0 : i32
    %c0_i32_0 = arith.constant 0 : i32
    %c0_i32_1 = arith.constant 0 : i32
    return %arg1, %c0_i32, %c0_i32_0 : i32, i32, i32
  }
  func.func @transform_8(%arg0: i32, %arg1: i32) -> (i32, i32, i32) {
    %c0_i32 = arith.constant 0 : i32
    %c0_i32_0 = arith.constant 0 : i32
    %c0_i32_1 = arith.constant 0 : i32
    return %arg1, %c0_i32, %c0_i32_0 : i32, i32, i32
  }
  func.func @transform_9(%arg0: i32, %arg1: i32) -> (i32, i32, i32) {
    %c0_i32 = arith.constant 0 : i32
    %c0_i32_0 = arith.constant 0 : i32
    %c0_i32_1 = arith.constant 0 : i32
    return %arg1, %c0_i32, %c0_i32_0 : i32, i32, i32
  }
  func.func @transform_10(%arg0: i32, %arg1: i32) -> (i32, i32, i32) {
    %c0_i32 = arith.constant 0 : i32
    %c0_i32_0 = arith.constant 0 : i32
    %c0_i32_1 = arith.constant 0 : i32
    return %arg1, %c0_i32, %c0_i32_0 : i32, i32, i32
  }
  func.func @transform_11(%arg0: i32, %arg1: i32) -> (i32, i32, i32) {
    %c0_i32 = arith.constant 0 : i32
    %c0_i32_0 = arith.constant 0 : i32
    %c0_i32_1 = arith.constant 0 : i32
    return %arg1, %c0_i32, %c0_i32_0 : i32, i32, i32
  }
  func.func @transform_12(%arg0: i32, %arg1: i32) -> (i32, i32, i32) {
    %c0_i32 = arith.constant 0 : i32
    %c0_i32_0 = arith.constant 0 : i32
    %c0_i32_1 = arith.constant 0 : i32
    return %arg1, %c0_i32, %c0_i32_0 : i32, i32, i32
  }
  func.func @transform_13(%arg0: i32, %arg1: i32) -> (i32, i32, i32) {
    %c0_i32 = arith.constant 0 : i32
    %c0_i32_0 = arith.constant 0 : i32
    %c0_i32_1 = arith.constant 0 : i32
    return %arg1, %c0_i32, %c0_i32_0 : i32, i32, i32
  }
  func.func @transform_14(%arg0: i32, %arg1: i32) -> (i32, i32, i32) {
    %c0_i32 = arith.constant 0 : i32
    %c0_i32_0 = arith.constant 0 : i32
    %c0_i32_1 = arith.constant 0 : i32
    return %arg0, %c0_i32, %c0_i32_0 : i32, i32, i32
  }
}

</mosaic_0001>

<bundles_post_ra>
// kernel: tpu_custom_call.1
= control target key start
LH: loop header
LB: loop body
LE: loop exit
PB: predicated region body
PF: predicated region fallthrough
CT: control target
= control target key end

     0   :  { %s3219_s0 = inlined_call_operand.hbm [shape: f32[2,8,32], index: 0, kind: input, shape index: {}]   ;;  %s3220_s1 = inlined_call_operand.hbm [shape: f32[2,1,8], index: 1, kind: input, shape index: {}]   ;;  %s3221_s2 = inlined_call_operand.vmem [shape: f32[2,1,32], index: 2, kind: input, shape index: {}]   ;;  %s3222_s3 = inlined_call_operand.hbm [shape: f32[2,1,32], index: 3, kind: input, shape index: {}]   ;;  %s3223_s4 = inlined_call_operand.vmem [shape: f32[2,32,128], index: 4, kind: input, shape index: {}]   ;;  %s3224_s5 = inlined_call_operand.vmem [shape: f32[2,1,128], index: 5, kind: input, shape index: {}]   ;;  %s3225_s6 = inlined_call_operand.vmem [shape: f32[2,32,32], index: 6, kind: input, shape index: {}]   ;;  %s3226_s7 = inlined_call_operand.vmem [shape: f32[2,1,32], index: 7, kind: input, shape index: {}]   ;;  %s3227_s8 = inlined_call_operand.vmem [shape: f32[2,1,32], index: 8, kind: input, shape index: {}]   ;;  %s3228_s9 = inlined_call_operand.vmem [shape: f32[2,1,32], index: 9, kind: input, shape index: {}]   ;;  %s3229_s10 = inlined_call_operand.vmem [shape: f32[2,32,64], index: 10, kind: input, shape index: {}]   ;;  %s3230_s11 = inlined_call_operand.vmem [shape: f32[2,1,64], index: 11, kind: input, shape index: {}]   ;;  %s3231_s12 = inlined_call_operand.vmem [shape: f32[2,64,32], index: 12, kind: input, shape index: {}]   ;;  %s3232_s13 = inlined_call_operand.vmem [shape: f32[2,1,32], index: 13, kind: input, shape index: {}]   ;;  %s3233_s14 = inlined_call_operand.hbm [shape: f32[2,8,32], index: 14, kind: output, shape index: {}]  }
   0x1   :  { %3251 = sst [smem:[#allocation28_spill]] %s3219_s0 }
   0x2   :  { %3252 = sst [smem:[#allocation29_spill]] %s3220_s1 }
   0x3   :  { %3253 = sst [smem:[#allocation30_spill]] %s3222_s3 }
   0x4   :  { %3254 = sst [smem:[#allocation31_spill]] %s3223_s4 }
   0x5   :  { %3255 = sst [smem:[#allocation32_spill]] %s3224_s5 }
   0x6   :  { %3256 = sst [smem:[#allocation33_spill]] %s3225_s6 }
   0x7   :  { %3257 = sst [smem:[#allocation34_spill]] %s3226_s7 }
   0x8   :  { %3258 = sst [smem:[#allocation35_spill]] %s3227_s8 }
   0x9   :  { %3259 = sst [smem:[#allocation36_spill]] %s3228_s9 }
   0xa   :  { %3260 = sst [smem:[#allocation37_spill]] %s3229_s10 }
   0xb   :  { %3261 = sst [smem:[#allocation38_spill]] %s3230_s11 }
   0xc   :  { %3262 = sst [smem:[#allocation39_spill]] %s3231_s12 }
   0xd   :  { %3263 = sst [smem:[#allocation40_spill]] %s3232_s13 }
   0xe   :  { %3264 = sst [smem:[#allocation41_spill]] %s3233_s14 }
   0xf   :  { %19 = vsyncpa [#allocation4], 0 }
  0x10   :  { %21 = vsyncpa [#allocation4 + $0x1], 0 }
  0x11   :  { %22 = vsyncpa [#allocation7], 0 }
  0x12   :  { %24 = vsyncpa [#allocation7 + $0x1], 0 }
  0x13   :  { %25 = vsyncpa [#allocation5], 0 }
  0x14   :  { %27 = vsyncpa [#allocation5 + $0x1], 0  ;;  %s2728_s29 = smov 0   ;;  %s2730_s30 = smov 0  }
  0x15   :  { %s2732_s15 = smov 0   ;;  %s2734_s16 = smov 0  }
  0x16   :  { %s2736_s17 = smov 0   ;;  %s2738_s18 = smov 0  }
  0x17   :  { %s2740_s19 = smov 0   ;;  %s2742_s20 = smov 0  }
  0x18   :  { %s2744_s21 = smov 0   ;;  %s2746_s22 = smov 0  }
  0x19   :  { %s2748_s23 = smov 0  }
  0x1a LB: > { %3265 = sst [smem:[#allocation14_spill]] %s2595_s30  ;;  %s2784_s24 = sadd.s32 4294967295, %s2631_s23   ;;  %s2631_s23 = sphi %s2748_s23, %s33_s23   ;;  %s2627_s22 = sphi %s2746_s22, %s3332_s22   ;;  %s2623_s21 = sphi %s2744_s21, %s3331_s21   ;;  %s2619_s20 = sphi %s2742_s20, %s3330_s20   ;;  %s2615_s19 = sphi %s2740_s19, %s3329_s19   ;;  %s2611_s18 = sphi %s2738_s18, %s3328_s18   ;;  %s2607_s17 = sphi %s2736_s17, %s3327_s17   ;;  %s2603_s16 = sphi %s2734_s16, %s3326_s16   ;;  %s2599_s15 = sphi %s2732_s15, %s3325_s15   ;;  %s2595_s30 = sphi %s2730_s30, %s3324_s30   ;;  %s2591_s29 = sphi %s2728_s29, %s3323_s29  }
  0x1b   : > { %3266 = sst [smem:[#allocation15_spill]] %s2599_s15  ;;  %s2088_s25 = sadd.s32 4294967294, %s2631_s23  }
  0x1c   : > { %3267 = sst [smem:[#allocation16_spill]] %s2603_s16  ;;  %p59_p0 = scmp.ne.s32.totalorder %s2611_s18, %s2607_s17 }
  0x1d   : > { %3268 = sst [smem:[#allocation17_spill]] %s2607_s17  ;;  %p3241_p1 = scmp.eq.s32.totalorder %s2631_s23, 0 }
  0x1e   : > { %3269 = sst [smem:[#allocation18_spill]] %s2611_s18  ;;  %p65_p2 = scmp.ne.s32.totalorder %s2607_s17, %s2603_s16 }
  0x1f   : > { %3270 = sst [smem:[#allocation19_spill]] %s2619_s20  ;;  %p3240_p3 = scmp.eq.s32.totalorder %s2784_s24, 0 }
  0x20   : > { %3271 = sst [smem:[#allocation20_spill]] %s2623_s21  ;;  %p61_p4 = por %p3241_p1, %p59_p0 }
  0x21   : > { %3272 = sst [smem:[#allocation21_spill]] %s2627_s22  ;;  %p427_p5 = scmp.eq.s32.totalorder %s2784_s24, 3 }
  0x22   : > { %p2800_p6 = por %p3240_p3, %p65_p2  ;;  %p433_p7 = scmp.eq.s32.totalorder %s2088_s25, 3 }
  0x23   : > { %p2804_p8 = por %p427_p5, %p59_p0  ;;  %p3239_p10 = scmp.lt.s32.totalorder %s2631_s23, 4 }
  0x24   : > { %p2808_p9 = por %p433_p7, %p65_p2  ;;  %s2814_s26 = sand.u32 1, %s2611_s18  }
  0x25   : > { %s3274_s14 = scalar_select %p2804_p8, 1, 0 }
  0x26   : > { %s3276_s27 = scalar_select %p2808_p9, 1, 0 }
  0x27   : > { %3275 = sst [smem:[#allocation22_spill]] %s3274_s14  ;;  %s471_s16 = sand.u32 1, %s2631_s23  }
  0x28   : > { %3277 = sst [smem:[#allocation23_spill]] %s3276_s27  ;;  %p2819_p11 = pnand %p3239_p10, %p61_p4 }
  0x29   : > { %s2093_s25 = sshll.u32 %s2627_s22, 4  ;;  %s3279_s1 = sld [smem:[#allocation29_spill]] }
  0x2a   : > { %s474_s11 = scalar_lea.vmem [#allocation6], %s2814_s26  ;;  %p2095_p12 = scmp.ge.s32.totalorder %s2631_s23, 1 }
  0x2b   : > { %s481_s10 = sshll.u32 %s474_s11, 4  ;;  %p577_p13 = scmp.lt.s32.totalorder %s2631_s23, 5  ;;  %s482_s10 = int_to_ptr.vmem [resolvable:$true] %s481_s10 }
  0x2c   : > { %s2830_s27 = scalar_lea.sflag [#allocation7], %s471_s16  ;;  %p2421_p0 = pneg %p2819_p11 }
  0x2d   : > { %s2432_s9 = scalar_lea.vmem %s482_s10, 16  ;;  %s2633_s8 = smov [#allocation6]  }
  0x2e   : > { %p2433_p2 = scmp.ne.s32.totalorder %s482_s10, %s2432_s9  ;;  %s2437_s7 = sshll.u32 %s2633_s8, 4  ;;  %s2438_s7 = int_to_ptr.vmem [resolvable:$false] %s2437_s7 }
  0x2f   : > { %s479_s14 = scalar_lea.hbm %s3279_s1, %s2093_s25  ;;  %s2439_s12 = scalar_lea.vmem %s2438_s7, 32 }
  0x30   : > { %p2435_p4 = pnand %p2433_p2, %p2421_p0  ;;  %p2440_p7 = scmp.lt.s32.totalorder %s482_s10, %s2438_s7 }
  0x31   : > { %p2441_p10 = scmp.lt.s32.totalorder %s2439_s12, %s2432_s9 }
  0x32   : > { %p2436_p5 = pneg %p2435_p4 }
  0x33   : > { %p2442_p3 = por %p2441_p10, %p2440_p7 }
  0x35   : > { %p2443_p1 = pnand %p2442_p3, %p2436_p5 }
  0x37   : > { %2446 = shalt.err (!%p2443_p1)
}
  0x38   : > { %2285 = dma.hbm_to_vmem [thread:$0]  (!%p2819_p11), %s479_s14, 16, %s482_s10, %s2830_s27  }
  0x39   : > { %p2844_p2 = pnand %p2095_p12, %p577_p13  ;;  %s2091_s7 = sshll.u32 %s2814_s26, 3 }
  0x3a   : > { %s2092_s9 = sshll.u32 %s2627_s22, 7  ;;  %s3281_s0 = sld [smem:[#allocation28_spill]] }
  0x3b   : > { %s457_s25 = scalar_lea.vmem [#allocation3], %s2091_s7  ;;  %s454_s1 = scalar_lea.sflag [#allocation4], %s2814_s26 }
  0x3c   : > { %s464_s12 = sshll.u32 %s457_s25, 4  ;;  %s2634_s10 = smov [#allocation3]   ;;  %s465_s12 = int_to_ptr.vmem [resolvable:$true] %s464_s12 }
  0x3d   : > { %s2460_s6 = scalar_lea.vmem %s465_s12, 128  ;;  %s2465_s14 = sshll.u32 %s2634_s10, 4  ;;  %s2466_s14 = int_to_ptr.vmem [resolvable:$false] %s2465_s14 }
  0x3e   : > { %p2461_p1 = scmp.ne.s32.totalorder %s465_s12, %s2460_s6  ;;  %s2467_s5 = scalar_lea.vmem %s2466_s14, 256 }
  0x3f   : > { %p2468_p12 = scmp.lt.s32.totalorder %s465_s12, %s2466_s14  ;;  %p2469_p13 = scmp.lt.s32.totalorder %s2467_s5, %s2460_s6 }
  0x40   : > { %s462_s16 = scalar_lea.hbm %s3281_s0, %s2092_s9  ;;  %p2463_p3 = pnand %p2461_p1, %p2421_p0 }
  0x41   : > { %p2470_p4 = por %p2469_p13, %p2468_p12 }
  0x42   : > { %p2464_p10 = pneg %p2463_p3 }
  0x44   : > { %p2471_p5 = pnand %p2470_p4, %p2464_p10 }
  0x46   : > { %2474 = shalt.err (!%p2471_p5)
}
  0x47   : > { %2282 = dma.hbm_to_vmem [thread:$0]  (!%p2819_p11), %s462_s16, 128, %s465_s12, %s454_s1  }
  0x48   : > { %s42_s5 = sadd.s32 1, %s2623_s21  ;;  %s130_s6 = sadd.s32 1, %s2599_s15 }
  0x49   : > { %p43_p0 = scmp.ge.s32.totalorder %s42_s5, 2  ;;  %p137_p7 = scmp.ne.s32.totalorder %s2599_s15, %s2595_s30 }
  0x4a   : > { %p143_p1 = scmp.ne.s32.totalorder %s2595_s30, %s2591_s29  ;;  %s496_s20 = sand.u32 1, %s2599_s15  }
  0x4b   : > { %s3334_s5 = smov (%p43_p0, %s42_s5), 0  ;;  %s3283_s26 = sadd.s32 1, %s2627_s22 }
  0x4c   : > { %3282 = sst [smem:[#allocation24_spill]] %s3334_s5  ;;  %s3336_s26 = smov (!%p43_p0, %s3283_s26), %s2627_s22 }
  0x4d   : > { %s127_s7 = ssub.s32 %s2623_s21, %s3334_s5  ;;  %p3284_p3 = scmp.eq.s32.totalorder %s2631_s23, 0 }
  0x4e   : > { %p47_p11 = scmp.ge.s32.totalorder %s3336_s26, 2  ;;  %p128_p12 = scmp.eq.s32.totalorder %s127_s7, 0 }
  0x4f   : > { %p139_p10 = por %p137_p7, %p3284_p3  ;;  %p3285_p13 = scmp.eq.s32.totalorder %s2784_s24, 0 }
  0x50   : > { %s3338_s26 = smov (%p47_p11, %s3336_s26), 0  ;;  %s2094_s11 = sshll.u32 %s2623_s21, 4 }
  0x51   : > { %p2877_p4 = por %p143_p1, %p3285_p13  ;;  %3287 = sst [smem:[#allocation25_spill]] %s3338_s26 }
  0x52   : > { %s2884_s29 = scalar_select %p128_p12, %s2599_s15, %s130_s6  }
  0x53   : > { %s49_s9 = ssub.s32 %s2627_s22, %s3338_s26  ;;  %s3289_s3 = sld [smem:[#allocation30_spill]] }
  0x54   : > { %3288 = sst [smem:[#allocation26_spill]] %s2884_s29  ;;  %p50_p5 = scmp.eq.s32.totalorder %s49_s9, 0 }
  0x55   : > { %s497_s12 = scalar_lea.vmem [#allocation8], %s496_s20  ;;  %p3290_p0 = scmp.lt.s32.totalorder %s2631_s23, 4 }
  0x56   : > { %s504_s10 = sshll.u32 %s497_s12, 4  ;;  %s3292_s7 = sadd.s32 1, %s2611_s18  ;;  %s505_s10 = int_to_ptr.vmem [resolvable:$true] %s504_s10 }
  0x57   : > { %p2894_p7 = pnand %p3290_p0, %p139_p10  ;;  %s2488_s6 = scalar_lea.vmem %s505_s10, 16 }
  0x58   : > { %s2901_s0 = scalar_select %p50_p5, %s2611_s18, %s3292_s7  }
  0x59   : > { %s502_s25 = scalar_lea.hbm %s3289_s3, %s2094_s11  ;;  %p2477_p1 = pneg %p2894_p7 }
  0x5a   : > { %3293 = sst [smem:[#allocation27_spill]] %s2901_s0  ;;  %p2489_p3 = scmp.ne.s32.totalorder %s505_s10, %s2488_s6 }
  0x5b   : > { %s2635_s9 = smov [#allocation8]  }
  0x5c   : > { %p2491_p11 = pnand %p2489_p3, %p2477_p1  ;;  %s2493_s11 = sshll.u32 %s2635_s9, 4  ;;  %s2494_s11 = int_to_ptr.vmem [resolvable:$false] %s2493_s11 }
  0x5d   : > { %s2495_s20 = scalar_lea.vmem %s2494_s11, 32  ;;  %p2496_p13 = scmp.lt.s32.totalorder %s505_s10, %s2494_s11 }
  0x5e   : > { %p2492_p12 = pneg %p2491_p11  ;;  %p2497_p10 = scmp.lt.s32.totalorder %s2495_s20, %s2488_s6 }
  0x60   : > { %p2498_p0 = por %p2497_p10, %p2496_p13 }
  0x62   : > { %p2499_p9 = pnand %p2498_p0, %p2492_p12 }
  0x64   : > { %2502 = shalt.err (!%p2499_p9)
}
  0x65   : > { %2288 = dma.hbm_to_vmem [thread:$0]  (!%p2894_p7), %s502_s25, 16, %s505_s10, %s2830_s27  }
  0x66   : > { %581 = sbr.rel (%p2844_p2) target bundleno = 2230 (0x8b6), region = 76  ;;  %s2911_s13 = sand.u32 (!%p2844_p2), 1, %s2607_s17  }
  0x67   : > { %s3242_s16 = sshll.u32 (!%p2844_p2), %s2911_s13, 3  ;;  %s584_s12 = scalar_lea.sflag (!%p2844_p2), [#allocation4], %s2911_s13 }
  0x68   : > { %s587_s7 = scalar_lea.vmem (!%p2844_p2), [#allocation3], %s3242_s16 }
  0x6b   : > { %2574 = dma.done.wait (%p2800_p6), %s584_s12, 128  }
  0x6c   : > { %2576 = vsyncadd (%p2800_p6), %s584_s12, 4294967168  ;;  %s592_s27 = sand.u32 1, %s2784_s24  }
  0x6d   : > { %s593_s8 = scalar_lea.sflag [#allocation7], %s592_s27 }
  0x6e   : > { %2578 = dma.done.wait (%p2800_p6), %s593_s8, 16  }
  0x6f   : > { %2580 = vsyncadd (%p2800_p6), %s593_s8, 4294967280  ;;  %s602_s10 = sand.u32 1, %s2595_s30  }
  0x70   : > { %s2928_s14 = scalar_lea.vmem [#allocation8], %s602_s10 }
  0x71   : > { %2582 = dma.done.wait (%p2877_p4), %s593_s8, 16  }
  0x72   : > { %2584 = vsyncadd (%p2877_p4), %s593_s8, 4294967280  ;;  %p697_p9 = scmp.lt.s32.totalorder %s2615_s19, 1  ;;  %s3294_s4 = sld [smem:[#allocation31_spill]] }
  0x73   : > { %s3296_s16 = sld [smem:[#allocation33_spill]]  ;;  %p2106_p6 = scmp.ne.s32.totalorder %s2615_s19, 0 }
  0x74   : > { %s2936_s24 = scalar_select %p697_p9, %s2615_s19, 1 }
  0x75   : > { %s3300_s8 = sld [smem:[#allocation37_spill]] }
  0x76   : > { %s2135_s9 = sshll.u32 %s2936_s24, 5  ;;  %s3301_s28 = sld [smem:[#allocation38_spill]] }
  0x77   : > { %s2138_s30 = sshll.u32 %s2936_s24, 6  ;;  %s3302_s26 = sld [smem:[#allocation40_spill]] }
  0x78   : > { %s2946_s12 = scalar_lea.vmem %s3294_s4, %s2135_s9  ;;  %s3299_s4 = sld [smem:[#allocation36_spill]] }
  0x79   : > { %s2955_s3 = scalar_lea.vmem %s3296_s16, %s2135_s9  ;;  %s3303_s1 = sld [smem:[#allocation39_spill]] }
  0x7b   : > { %s2972_s10 = scalar_lea.vmem %s3300_s8, %s2135_s9  ;;  %741 = sbr.rel (%p2106_p6) target bundleno = 130 (0x82), region = 92 }
  0x7c   : > { %s729_s25 = scalar_lea.vmem %s3301_s28, %s2936_s24 }
  0x7d   : > { %s737_s21 = scalar_lea.vmem %s3302_s26, %s2936_s24 }
  0x7e   : > { %s721_s29 = scalar_lea.vmem %s3299_s4, %s2936_s24  ;;  %s3304_s4 = sshll.u32 %s2911_s13, 3 }
  0x7f   : > { %s2986_s17 = scalar_lea.vmem %s3303_s1, %s2138_s30  ;;  %s2990_s11 = scalar_lea.vmem [#allocation9], %s3304_s4 }
  0x80   : > { %v742_v0 = vld [vmem:[%s587_s7] sm:$0xff]  ;;  %vm743_vm0 = vcmask 261120  }
  0x81   : > { %744 = vst.msk [vmem:[%s2990_s11] sm:$0xff] %vm743_vm0, %v742_v0 }
  0x82 PF: > { %vm751_vm1 = vcmask 261120   ;;  %v785_v5 = vld [vmem:[%s2946_s12 + $0x18] sm:$0xff]  ;;  %v2636_v6 = vmov 0.0   ;;  %v784_v7 = vld [vmem:[%s2946_s12 + $0x10] sm:$0xff]  ;;  %vm2637_vm2 = vmmov 0   ;;  %v783_v8 = vld [vmem:[%s2946_s12 + $0x8] sm:$0xff]  ;;  %s3305_s19 = scalar_lea.vmem %s3221_s2, %s2936_s24  ;;  %v867_v35 = vlaneseq }
  0x83   : > { %2179 = vmatprep.subr.mxu1 %v2636_v6  ;;  %2187 = vmatprep.mubr.msk.f32.mxu1 %vm2637_vm2, %v2636_v6  ;;  %v782_v9 = vld [vmem:[%s2946_s12] sm:$0xff]  ;;  %s3306_s12 = sld [smem:[#allocation32_spill]]  ;;  %s2638_s27 = smov 120   ;;  %vm875_vm3 = vcmask 64512   ;;  %vm1207_vm5 = vcmask 130112   ;;  %vm1378_vm6 = vcmask 195712  }
  0x84   : > { %2180 = vmatpush3.msra.mxu1 %v785_v5  ;;  %2200 = vmatprep.subr.mxu0 %v2636_v6  ;;  %v2107_v19 = vld [vmem:[%s3305_s19] ss:$0 sm:$0xff]  ;;  %s2640_s8 = smov 88   ;;  %s2641_s6 = smov 80   ;;  %v868_v37 = vshrl.u32 %v867_v35, 7  ;;  %vm1549_vm7 = vcmask 261312  }
  0x85   : > { %2181 = vmatprep.subr.mxu1 %v2636_v6  ;;  %2202 = vmatprep.mubr.msk.f32.mxu0 %vm2637_vm2, %v2636_v6  ;;  %v2108_v21 = vld [vmem:[%s2928_s14] ss:$0 sm:$0xff]  ;;  %s2639_s14 = smov 96   ;;  %s2642_s16 = smov 112   ;;  %vm1768_vm8 = vcmask 523264  }
  0x86   : > { %2182 = vmatpush3.msra.mxu1 %v784_v7  ;;  %s2643_s28 = smov 72   ;;  %s2644_s5 = smov 104   ;;  %v869_v38 = vsub.s32 0, %v868_v37 }
  0x87   : > { %2183 = vmatprep.subr.mxu1 %v2636_v6  ;;  %s3308_s22 = scalar_lea.vmem [#allocation6], %s2911_s13  ;;  %s2645_s26 = smov 64  }
  0x88   : > { %v2995_v1 = vld [vmem:[%s2990_s11] sm:$0xff]  ;;  %2184 = vmatpush3.msra.mxu1 %v783_v8  ;;  %s2646_s0 = smov 48   ;;  %s2647_s18 = smov 40  }
  0x89   : > { %v752_v2 = vsel %vm751_vm1, %v2995_v1, 0.0  ;;  %v757_v3 = vmul.f32 %v2995_v1, %v2995_v1  ;;  %2185 = vmatprep.subr.mxu1 %v2636_v6  ;;  %s3307_s20 = scalar_lea.vmem %s3306_s12, %s2936_s24  ;;  %v746_v36 = vld [vmem:[%s3308_s22] sm:$0x1]  ;;  %s2648_s1 = smov 56  }
  0x8a   : > { %753 = vadd.xlane.f32.xlu0 %v752_v2  ;;  %2186 = vmatpush3.msra.mxu1 %v782_v9  ;;  %v2109_v24 = vld [vmem:[%s3307_s20] ss:$0 sm:$0xff]  ;;  %vm747_vm4 = vcmp.eq.f32.partialorder %v746_v36, 0.0  ;;  %s2649_s4 = smov 8   ;;  %v1553_v36 = vld [vmem:[%s2955_s3 + $0x8] sm:$0xff]  ;;  %s2650_s30 = smov 16  }
  0x8b   : > { %v758_v4 = vsel %vm751_vm1, %v757_v3, 0.0  ;;  %2190 = vmatprep.subr.mxu1 %v2636_v6  ;;  %v748_v39 = vsel %vm747_vm4, -1e+09, %v2636_v6  ;;  %s2651_s15 = smov 24   ;;  %s3309_s7 = sld [smem:[#allocation34_spill]] }
  0x8c   : > { %v870_v40 = vrot.slane %v748_v39, %v869_v38  ;;  %v1552_v38 = vld [vmem:[%s2955_s3] sm:$0xff]  ;;  %s3311_s20 = sld [smem:[#allocation35_spill]]  ;;  %s1845_s19 = scalar_lea.sflag [#allocation5], %s2911_s13 }
  0x8e   : > { %759 = vadd.xlane.f32.xlu0 %v758_v4 }
  0x91   : > { %s3310_s9 = scalar_lea.vmem %s3309_s7, %s2936_s24 }
 0x113   : > { %v754_v10 = vpop.xlane.xlu0 %753 }
 0x114   : > { %v756_v11 = vmul.f32 0.03125, %v754_v10 }
 0x116   : > { %v762_v13 = vmul.f32 %v756_v11, %v756_v11  ;;  %v764_v17 = vsub.f32 %v2995_v1, %v756_v11 }
 0x117   : > { %v760_v12 = vpop.xlane.xlu0 %759 }
 0x118   : > { %v761_v14 = vmul.f32 0.03125, %v760_v12 }
 0x11a   : > { %v763_v15 = vsub.f32 %v761_v14, %v762_v13 }
 0x11c   : > { %v765_v16 = vadd.f32 1e-06, %v763_v15 }
 0x11e   : > { %2399 = vrsqrt.f32 %v765_v16 }
 0x12b   : > { %v2400_v18 = vpop.eup %2399 }
 0x12c   : > { %v767_v20 = vmul.f32 %v2400_v18, %v764_v17 }
 0x12e   : > { %v774_v22 = vmul.f32 %v2107_v19, %v767_v20 }
 0x130   : > { %v781_v23 = vadd.f32 %v2108_v21, %v774_v22 }
 0x132   : > { %2188 = vmatmul.mubr.msk.f32.vlgmr.msra.gmra.mxu1 %vm751_vm1, %v781_v23 }
 0x133   : > { %2192 = vmatprep.mubr.msk.f32.mxu1 %vm2637_vm2, %v2636_v6 }
 0x1f2   : > { %v862_v25 = vpop.f32.mrf.mxu1 }
 0x1f3   : > { %v3031_v26 = vadd.f32 %v2109_v24, %v862_v25 }
 0x1f4   : > { %v2189_v27 = vpop.f32.mrf.mxu1 }
 0x1f5   : > { %1038 = vrot.lane.b32.xlu0 %v3031_v26, %s2638_s27  ;;  %873 = vrot.lane.b32.xlu1 %v3031_v26, %s2639_s14  ;;  %s3312_s27 = scalar_lea.vmem %s3311_s20, %s2936_s24 }
 0x1f9   : > { %1040 = vrot.lane.b32.xlu1 %v3031_v26, %s2640_s8 }
 0x1fd   : > { %1211 = vrot.lane.b32.xlu1 %v3031_v26, %s2641_s6 }
 0x201   : > { %1209 = vrot.lane.b32.xlu1 %v3031_v26, %s2642_s16  ;;  %s3314_s16 = sld [smem:[#allocation19_spill]] }
 0x205   : > { %1382 = vrot.lane.b32.xlu1 %v3031_v26, %s2643_s28 }
 0x209   : > { %1380 = vrot.lane.b32.xlu1 %v3031_v26, %s2644_s5 }
 0x267   : > { %v874_v28 = vpop.permute.xlu1 %873  ;;  %v1039_v30 = vpop.permute.xlu0 %1038 }
 0x268   : > { %2191 = vmatpush3.xpose.msk.msra.mxu1 %vm875_vm3, %v874_v28 }
 0x269   : > { %2195 = vmatprep.subr.mxu1 %v2636_v6 }
 0x26b   : > { %2193 = vmatmul.mubr.msk.f32.vlgmr.msra.gmra.mxu1 %vm875_vm3, %v3031_v26  ;;  %v1041_v29 = vpop.permute.xlu1 %1040 }
 0x26c   : > { %2201 = vmatpush3.xpose.msk.msra.mxu0 %vm875_vm3, %v1041_v29  ;;  %2197 = vmatprep.mubr.msk.f32.mxu1 %vm2637_vm2, %v2636_v6 }
 0x26d   : > { %2210 = vmatprep.subr.mxu0 %v2636_v6 }
 0x26f   : > { %2203 = vmatmul.mubr.msk.f32.vlgmr.msra.gmra.mxu0 %vm875_vm3, %v1039_v30  ;;  %v1212_v31 = vpop.permute.xlu1 %1211 }
 0x270   : > { %2211 = vmatpush3.xpose.msk.msra.mxu0 %vm875_vm3, %v1212_v31  ;;  %2212 = vmatprep.mubr.msk.f32.mxu0 %vm2637_vm2, %v2636_v6 }
 0x271   : > { %2220 = vmatprep.subr.mxu0 %v2636_v6 }
 0x273   : > { %v1210_v32 = vpop.permute.xlu1 %1209 }
 0x274   : > { %2213 = vmatmul.mubr.msk.f32.vlgmr.msra.gmra.mxu0 %vm875_vm3, %v1210_v32 }
 0x275   : > { %2222 = vmatprep.mubr.msk.f32.mxu0 %vm2637_vm2, %v2636_v6 }
 0x277   : > { %v1383_v33 = vpop.permute.xlu1 %1382 }
 0x278   : > { %2221 = vmatpush3.xpose.msk.msra.mxu0 %vm875_vm3, %v1383_v33  ;;  %v1555_v33 = vld [vmem:[%s2955_s3 + $0x18] sm:$0xff] }
 0x279   : > { %2230 = vmatprep.subr.mxu0 %v2636_v6 }
 0x27b   : > { %v1381_v34 = vpop.permute.xlu1 %1380 }
 0x27c   : > { %2223 = vmatmul.mubr.msk.f32.vlgmr.msra.gmra.mxu0 %vm875_vm3, %v1381_v34  ;;  %v1554_v34 = vld [vmem:[%s2955_s3 + $0x10] sm:$0xff] }
 0x27d   : > { %2238 = vmatprep.mubr.msk.f32.mxu0 %vm2637_vm2, %v2636_v6  ;;  %2231 = vmatpush3.msra.mxu0 %v1555_v33 }
 0x27e   : > { %2232 = vmatprep.subr.mxu0 %v2636_v6 }
 0x27f   : > { %2233 = vmatpush3.msra.mxu0 %v1554_v34 }
 0x280   : > { %2234 = vmatprep.subr.mxu0 %v2636_v6 }
 0x281   : > { %2235 = vmatpush3.msra.mxu0 %v1553_v36 }
 0x282   : > { %2236 = vmatprep.subr.mxu0 %v2636_v6 }
 0x283   : > { %2237 = vmatpush3.msra.mxu0 %v1552_v38 }
 0x284   : > { %2252 = vmatprep.subr.mxu0 %v2636_v6 }
 0x32b   : > { %v946_v41 = vpop.f32.mrf.mxu1 }
 0x32c   : > { %v947_v42 = vadd.f32 %v946_v41, %v870_v40 }
 0x32d   : > { %v2194_v43 = vpop.f32.mrf.mxu1 }
 0x32e   : > { %v950_v44 = vsel %vm875_vm3, %v947_v42, -inf }
 0x32f   : > { %v1112_v45 = vpop.f32.mrf.mxu0  ;;  %951 = vmax.xlane.f32.xlu1 %v950_v44 }
 0x330   : > { %v1113_v46 = vadd.f32 %v1112_v45, %v870_v40 }
 0x331   : > { %v2204_v47 = vpop.f32.mrf.mxu0 }
 0x332   : > { %v1116_v48 = vsel %vm875_vm3, %v1113_v46, -inf  ;;  %v2123_v47 = vld [vmem:[%s3310_s9] ss:$0 sm:$0xff] }
 0x333   : > { %1117 = vmax.xlane.f32.xlu0 %v1116_v48 }
 0x334   : > { %v1283_v49 = vpop.f32.mrf.mxu0 }
 0x335   : > { %v1284_v50 = vadd.f32 %v1283_v49, %v870_v40 }
 0x336   : > { %v2214_v51 = vpop.f32.mrf.mxu0 }
 0x337   : > { %v1287_v52 = vsel %vm875_vm3, %v1284_v50, -inf }
 0x338   : > { %1288 = vmax.xlane.f32.xlu1 %v1287_v52 }
 0x33c   : > { %v1454_v53 = vpop.f32.mrf.mxu0 }
 0x33d   : > { %v1455_v54 = vadd.f32 %v1454_v53, %v870_v40 }
 0x33e   : > { %v2224_v55 = vpop.f32.mrf.mxu0 }
 0x33f   : > { %v1458_v56 = vsel %vm875_vm3, %v1455_v54, -inf  ;;  %v1671_v55 = vld [vmem:[%s2972_s10 + $0x18] sm:$0xff] }
 0x340   : > { %1459 = vmax.xlane.f32.xlu0 %v1458_v56  ;;  %v1670_v56 = vld [vmem:[%s2972_s10 + $0x10] sm:$0xff] }
 0x349   : > { %961 = vrot.lane.b32.xlu1 %v3031_v26, %s2645_s26 }
 0x3b8   : > { %v952_v57 = vpop.xlane.xlu1 %951 }
 0x3b9   : > { %v953_v58 = vsub.f32 %v947_v42, %v952_v57  ;;  %v1668_v57 = vld [vmem:[%s2972_s10] sm:$0xff] }
 0x3bb   : > { %v954_v59 = vmul.f32 1.442695, %v953_v58  ;;  %v1760_v58 = vld [vmem:[%s2986_s17 + $0x38] sm:$0xff] }
 0x3bc   : > { %v1118_v60 = vpop.xlane.xlu0 %1117 }
 0x3bd   : > { %2401 = vpow2.f32 %v954_v59  ;;  %v1119_v61 = vsub.f32 %v1113_v46, %v1118_v60  ;;  %v1759_v59 = vld [vmem:[%s2986_s17 + $0x30] sm:$0xff]  ;;  %v1758_v60 = vld [vmem:[%s2986_s17 + $0x28] sm:$0xff] }
 0x3bf   : > { %v1120_v62 = vmul.f32 1.442695, %v1119_v61  ;;  %v1757_v61 = vld [vmem:[%s2986_s17 + $0x20] sm:$0xff] }
 0x3c1   : > { %2403 = vpow2.f32 %v1120_v62  ;;  %v1289_v63 = vpop.xlane.xlu1 %1288  ;;  %v1756_v62 = vld [vmem:[%s2986_s17 + $0x18] sm:$0xff] }
 0x3c2   : > { %v1290_v0 = vsub.f32 %v1284_v50, %v1289_v63 }
 0x3c4   : > { %v1291_v2 = vmul.f32 1.442695, %v1290_v0 }
 0x3c5   : > { %v962_v3 = vpop.permute.xlu1 %961 }
 0x3c6   : > { %2405 = vpow2.f32 %v1291_v2  ;;  %2196 = vmatpush3.msra.mxu1 %v962_v3 }
 0x3c7   : > { %2205 = vmatprep.subr.mxu1 %v2636_v6 }
 0x3c9   : > { %v1460_v4 = vpop.xlane.xlu0 %1459 }
 0x3ca   : > { %v2402_v5 = vpop.eup %2401  ;;  %v1461_v7 = vsub.f32 %v1455_v54, %v1460_v4 }
 0x3cb   : > { %v956_v8 = vsel %vm875_vm3, %v2402_v5, 0.0 }
 0x3cc   : > { %v1462_v9 = vmul.f32 1.442695, %v1461_v7  ;;  %957 = vadd.xlane.f32.xlu1 %v956_v8 }
 0x3ce   : > { %v2404_v10 = vpop.eup %2403  ;;  %2407 = vpow2.f32 %v1462_v9 }
 0x3cf   : > { %v1122_v11 = vsel %vm875_vm3, %v2404_v10, 0.0 }
 0x3d0   : > { %1123 = vadd.xlane.f32.xlu0 %v1122_v11 }
 0x3d3   : > { %v2406_v12 = vpop.eup %2405 }
 0x3d4   : > { %v1293_v13 = vsel %vm875_vm3, %v2406_v12, 0.0 }
 0x3d5   : > { %1294 = vadd.xlane.f32.xlu1 %v1293_v13 }
 0x3db   : > { %v2408_v14 = vpop.eup %2407 }
 0x3dc   : > { %v1464_v15 = vsel %vm875_vm3, %v2408_v14, 0.0 }
 0x3dd   : > { %1465 = vadd.xlane.f32.xlu0 %v1464_v15  ;;  %v1755_v15 = vld [vmem:[%s2986_s17 + $0x10] sm:$0xff] }
 0x3e6   : > { %1298 = vrot.lane.b32.xlu1 %v3031_v26, %s2646_s0 }
 0x3ea   : > { %1469 = vrot.lane.b32.xlu1 %v3031_v26, %s2647_s18  ;;  %s2132_s18 = sshll.u32 %s3314_s16, 7 }
 0x3f3   : > { %1127 = vrot.lane.b32.xlu0 %v3031_v26, %s2648_s1  ;;  %s1858_s1 = sshll.u32 %s2990_s11, 4  ;;  %s1859_s1 = int_to_ptr.vmem [resolvable:$true] %s1858_s1 }
 0x3f4   : > { %s2503_s7 = scalar_lea.vmem %s1859_s1, 128 }
 0x3f5   : > { %p2504_p2 = scmp.ne.s32.totalorder %s1859_s1, %s2503_s7 }
 0x3f7   : > { %p2505_p4 = pnand %p2504_p2, %p2804_p8 }
 0x3f9   : > { %p2506_p5 = pneg %p2505_p4 }
 0x455   : > { %v958_v16 = vpop.xlane.xlu1 %957 }
 0x456   : > { %2409 = vrcp.f32 %v958_v16  ;;  %v1754_v16 = vld [vmem:[%s2986_s17 + $0x8] sm:$0xff] }
 0x459   : > { %v1124_v17 = vpop.xlane.xlu0 %1123 }
 0x45a   : > { %2411 = vrcp.f32 %v1124_v17  ;;  %v1753_v17 = vld [vmem:[%s2986_s17] sm:$0xff] }
 0x45e   : > { %v1295_v18 = vpop.xlane.xlu1 %1294 }
 0x45f   : > { %2413 = vrcp.f32 %v1295_v18  ;;  %v2127_v18 = vld [vmem:[%s729_s25] ss:$0 sm:$0xff] }
 0x462   : > { %v1299_v23 = vpop.permute.xlu1 %1298 }
 0x463   : > { %v2410_v19 = vpop.eup %2409 }
 0x464   : > { %v960_v20 = vmul.f32 %v2410_v19, %v2402_v5 }
 0x466   : > { %v1466_v21 = vpop.xlane.xlu0 %1465  ;;  %2198 = vmatmul.mubr.msk.f32.vlgmr.msra.gmra.mxu1 %vm875_vm3, %v960_v20  ;;  %v1470_v28 = vpop.permute.xlu1 %1469 }
 0x467   : > { %v2412_v22 = vpop.eup %2411  ;;  %2415 = vrcp.f32 %v1466_v21  ;;  %2207 = vmatprep.mubr.msk.f32.mxu1 %vm2637_vm2, %v2636_v6 }
 0x468   : > { %v1126_v25 = vmul.f32 %v2412_v22, %v2404_v10  ;;  %v2125_v10 = vld [vmem:[%s3312_s27] ss:$0 sm:$0xff] }
 0x46a   : > { %v1128_v24 = vpop.permute.xlu0 %1127 }
 0x46b   : > { %2206 = vmatpush3.msra.mxu1 %v1128_v24 }
 0x46c   : > { %v2414_v26 = vpop.eup %2413  ;;  %2208 = vmatmul.mubr.msk.f32.vlgmr.msra.gmra.mxu1 %vm875_vm3, %v1126_v25  ;;  %2215 = vmatprep.subr.mxu1 %v2636_v6 }
 0x46d   : > { %2216 = vmatpush3.msra.mxu1 %v1299_v23  ;;  %2217 = vmatprep.mubr.msk.f32.mxu1 %vm2637_vm2, %v2636_v6  ;;  %v1297_v27 = vmul.f32 %v2414_v26, %v2406_v12  ;;  %v2126_v12 = vld [vmem:[%s721_s29] ss:$0 sm:$0xff] }
 0x46e   : > { %2225 = vmatprep.subr.mxu1 %v2636_v6 }
 0x470   : > { %2218 = vmatmul.mubr.msk.f32.vlgmr.msra.gmra.mxu1 %vm875_vm3, %v1297_v27 }
 0x471   : > { %2226 = vmatpush3.msra.mxu1 %v1470_v28  ;;  %2227 = vmatprep.mubr.msk.f32.mxu1 %vm2637_vm2, %v2636_v6 }
 0x472   : > { %2241 = vmatprep.subr.mxu1 %v2636_v6 }
 0x474   : > { %v2416_v29 = vpop.eup %2415 }
 0x475   : > { %v1468_v30 = vmul.f32 %v2416_v29, %v2408_v14 }
 0x477   : > { %2228 = vmatmul.mubr.msk.f32.vlgmr.msra.gmra.mxu1 %vm875_vm3, %v1468_v30 }
 0x478   : > { %2249 = vmatprep.mubr.msk.f32.mxu1 %vm2637_vm2, %v2636_v6  ;;  %2242 = vmatpush3.msra.mxu1 %v1671_v55 }
 0x479   : > { %2243 = vmatprep.subr.mxu1 %v2636_v6 }
 0x47a   : > { %2244 = vmatpush3.msra.mxu1 %v1670_v56 }
 0x47b   : > { %2245 = vmatprep.subr.mxu1 %v2636_v6 }
 0x526   : > { %v1033_v31 = vpop.f32.mrf.mxu1 }
 0x527   : > { %1037 = vst.msk [vmem:[#allocation2] sm:$0xff] %vm875_vm3, %v1033_v31 }
 0x528   : > { %v2199_v32 = vpop.f32.mrf.mxu1 }
 0x52c   : > { %v1199_v35 = vpop.f32.mrf.mxu1 }
 0x52d   : > { %1204 = vrot.lane.b32.xlu0 %v1199_v35, %s2649_s4 }
 0x52e   : > { %v2209_v37 = vpop.f32.mrf.mxu1 }
 0x530   : > { %v1370_v39 = vpop.f32.mrf.mxu1 }
 0x531   : > { %1375 = vrot.lane.b32.xlu1 %v1370_v39, %s2650_s30  ;;  %s3318_s30 = sld [smem:[#allocation41_spill]] }
 0x532   : > { %v2219_v40 = vpop.f32.mrf.mxu1 }
 0x537   : > { %v1541_v41 = vpop.f32.mrf.mxu1  ;;  %s3319_s3 = smov %s3318_s30 }
 0x538   : > { %1546 = vrot.lane.b32.xlu0 %v1541_v41, %s2651_s15  ;;  %s1856_s15 = scalar_lea.hbm %s3318_s30, %s2132_s18 }
 0x539   : > { %v2229_v42 = vpop.f32.mrf.mxu1 }
 0x59f   : > { %v1205_v43 = vpop.permute.xlu0 %1204 }
 0x5a0   : > { %1208 = vst.msk [vmem:[#allocation2] sm:$0xff] %vm1207_vm5, %v1205_v43 }
 0x5a3   : > { %v1376_v44 = vpop.permute.xlu1 %1375 }
 0x5a4   : > { %1379 = vst.msk [vmem:[#allocation2] sm:$0xff] %vm1378_vm6, %v1376_v44 }
 0x5aa   : > { %v1547_v45 = vpop.permute.xlu0 %1546 }
 0x5ab   : > { %1550 = vst.msk [vmem:[#allocation2] sm:$0xff] %vm1549_vm7, %v1547_v45 }
 0x5b2   : > { %v1551_v46 = vld [vmem:[#allocation2] sm:$0xff] }
 0x5b3   : > { %2239 = vmatmul.mubr.msk.f32.vlgmr.msra.gmra.mxu0 %vm751_vm1, %v1551_v46 }
 0x5b4   : > { %2268 = vmatprep.mubr.msk.f32.mxu0 %vm2637_vm2, %v2636_v6  ;;  %2253 = vmatpush3.msra.mxu0 %v1760_v58 }
 0x5b5   : > { %2254 = vmatprep.subr.mxu0 %v2636_v6 }
 0x5b6   : > { %2255 = vmatpush3.msra.mxu0 %v1759_v59 }
 0x5b7   : > { %2256 = vmatprep.subr.mxu0 %v2636_v6 }
 0x5b8   : > { %2257 = vmatpush3.msra.mxu0 %v1758_v60 }
 0x5b9   : > { %2258 = vmatprep.subr.mxu0 %v2636_v6 }
 0x5ba   : > { %2259 = vmatpush3.msra.mxu0 %v1757_v61 }
 0x5bb   : > { %2260 = vmatprep.subr.mxu0 %v2636_v6 }
 0x5bc   : > { %2261 = vmatpush3.msra.mxu0 %v1756_v62 }
 0x5bd   : > { %2262 = vmatprep.subr.mxu0 %v2636_v6 }
 0x5be   : > { %2263 = vmatpush3.msra.mxu0 %v1755_v15 }
 0x5bf   : > { %2264 = vmatprep.subr.mxu0 %v2636_v6 }
 0x5c0   : > { %2265 = vmatpush3.msra.mxu0 %v1754_v16 }
 0x5c1   : > { %2266 = vmatprep.subr.mxu0 %v2636_v6 }
 0x5c2   : > { %2267 = vmatpush3.msra.mxu0 %v1753_v17 }
 0x673   : > { %v1632_v48 = vpop.f32.mrf.mxu0 }
 0x674   : > { %v1633_v49 = vadd.f32 %v2123_v47, %v1632_v48 }
 0x675   : > { %v2240_v50 = vpop.f32.mrf.mxu0 }
 0x676   : > { %v3110_v51 = vadd.f32 %v1633_v49, %v2995_v1  ;;  %v1669_v1 = vld [vmem:[%s2972_s10 + $0x8] sm:$0xff] }
 0x677   : > { %2246 = vmatpush3.msra.mxu1 %v1669_v1 }
 0x678   : > { %v1639_v52 = vsel %vm751_vm1, %v3110_v51, 0.0  ;;  %v1643_v53 = vmul.f32 %v3110_v51, %v3110_v51  ;;  %2247 = vmatprep.subr.mxu1 %v2636_v6  ;;  %v2129_v6 = vld [vmem:[%s737_s21] ss:$0 sm:$0xff]  ;;  %s2652_s21 = smov [#allocation9]  }
 0x679   : > { %1640 = vadd.xlane.f32.xlu1 %v1639_v52  ;;  %2248 = vmatpush3.msra.mxu1 %v1668_v57  ;;  %s2507_s24 = sshll.u32 %s2652_s21, 4  ;;  %s2508_s24 = int_to_ptr.vmem [resolvable:$false] %s2507_s24 }
 0x67a   : > { %v1644_v54 = vsel %vm751_vm1, %v1643_v53, 0.0  ;;  %s2509_s9 = scalar_lea.vmem %s2508_s24, 256  ;;  %p2510_p7 = scmp.lt.s32.totalorder %s1859_s1, %s2508_s24 }
 0x67b   : > { %1645 = vadd.xlane.f32.xlu0 %v1644_v54  ;;  %p2511_p1 = scmp.lt.s32.totalorder %s2509_s9, %s2503_s7 }
 0x67d   : > { %p2512_p3 = por %p2511_p1, %p2510_p7 }
 0x67f   : > { %p2513_p11 = pnand %p2512_p3, %p2506_p5 }
 0x702   : > { %v1641_v63 = vpop.xlane.xlu1 %1640 }
 0x703   : > { %v1642_v0 = vmul.f32 0.03125, %v1641_v63 }
 0x704   : > { %v1646_v2 = vpop.xlane.xlu0 %1645 }
 0x705   : > { %v1648_v3 = vmul.f32 %v1642_v0, %v1642_v0  ;;  %v1647_v4 = vmul.f32 0.03125, %v1646_v2  ;;  %v1650_v8 = vsub.f32 %v3110_v51, %v1642_v0 }
 0x707   : > { %v1649_v5 = vsub.f32 %v1647_v4, %v1648_v3 }
 0x709   : > { %v1651_v7 = vadd.f32 1e-05, %v1649_v5 }
 0x70b   : > { %2417 = vrsqrt.f32 %v1651_v7 }
 0x718   : > { %v2418_v9 = vpop.eup %2417 }
 0x719   : > { %v1653_v11 = vmul.f32 %v2418_v9, %v1650_v8 }
 0x71b   : > { %v1660_v13 = vmul.f32 %v2125_v10, %v1653_v11 }
 0x71d   : > { %v1667_v14 = vadd.f32 %v2126_v12, %v1660_v13 }
 0x71f   : > { %2250 = vmatmul.mubr.msk.f32.vlgmr.msra.gmra.mxu1 %vm751_vm1, %v1667_v14 }
 0x7df   : > { %v1748_v19 = vpop.f32.mrf.mxu1 }
 0x7e0   : > { %v1749_v20 = vadd.f32 %v2127_v18, %v1748_v19 }
 0x7e1   : > { %v2251_v21 = vpop.f32.mrf.mxu1 }
 0x7e2   : > { %v1752_v22 = vmax.f32 %v1749_v20, 0.0 }
 0x7e4   : > { %2269 = vmatmul.mubr.msk.f32.vlgmr.msra.gmra.mxu0 %vm1768_vm8, %v1752_v22 }
 0x8a4   : > { %v1838_v23 = vpop.f32.mrf.mxu0 }
 0x8a5   : > { %v1839_v24 = vadd.f32 %v2129_v6, %v1838_v23 }
 0x8a6   : > { %v2270_v25 = vpop.f32.mrf.mxu0 }
 0x8a7   : > { %v1842_v26 = vadd.f32 %v1839_v24, %v3110_v51 }
 0x8a9   : > { %1843 = vst.msk [vmem:[%s2990_s11] sm:$0xff] %vm751_vm1, %v1842_v26 }
 0x8aa   : > { %2516 = shalt.err (!%p2513_p11)
}
 0x8ab   : > { %s2517_s10 = scalar_lea.hbm %s1856_s15, 128  ;;  %s2521_s12 = scalar_lea.hbm %s3319_s3, 256 }
 0x8ac   : > { %p2518_p12 = scmp.ne.s32.totalorder %s1856_s15, %s2517_s10  ;;  %p2522_p0 = scmp.lt.s32.totalorder %s1856_s15, %s3319_s3 }
 0x8ad   : > { %p2523_p9 = scmp.lt.s32.totalorder %s2521_s12, %s2517_s10 }
 0x8ae   : > { %p2519_p13 = pnand %p2518_p12, %p2804_p8 }
 0x8af   : > { %p2524_p6 = por %p2523_p9, %p2522_p0 }
 0x8b0   : > { %p2520_p10 = pneg %p2519_p13 }
 0x8b2   : > { %p2525_p2 = pnand %p2524_p6, %p2520_p10 }
 0x8b4   : > { %2528 = shalt.err (!%p2525_p2)
}
 0x8b5   : > { %2277 = dma.vmem_to_hbm [thread:$0]  (%p2804_p8), %s1859_s1, 128, %s1856_s15, %s1845_s19  }
 0x8b6 PF: > { %s3320_s14 = sld [smem:[#allocation16_spill]]  ;;  %p2294_p4 = scmp.ge.s32.totalorder %s2631_s23, 2 }
 0x8b7   : > { %s3321_s8 = sld [smem:[#allocation23_spill]] }
 0x8bc   : > { %s1870_s6 = sand.u32 1, %s3320_s14  }
 0x8bd   : > { %p3322_p5 = scmp.ne.s32.totalorder %s3321_s8, 0  ;;  %s1871_s16 = scalar_lea.sflag [#allocation5], %s1870_s6 }
 0x8bf   : > { %p2290_p7 = pnand %p2294_p4, %p3322_p5 }
 0x8c1   : > { %p2291_p1 = pneg %p2290_p7 }
 0x8c3   : > { %2586 = dma.done.wait (%p2291_p1), %s1871_s16, 128  }
 0x8c4   : > { %2588 = vsyncadd (%p2291_p1), %s1871_s16, 4294967168  ;;  %s33_s23 = sadd.s32 1, %s2631_s23   ;;  %s3323_s29 = sld [smem:[#allocation14_spill]] }
 0x8c5   : > { %p30_p3 = scmp.ge.s32.totalorder %s33_s23, 6   ;;  %s3324_s30 = sld [smem:[#allocation15_spill]] }
 0x8c6   : > { %s3325_s15 = sld [smem:[#allocation26_spill]] }
 0x8c7   : > { %s3326_s16 = sld [smem:[#allocation17_spill]] }
 0x8c8   : > { %s3327_s17 = sld [smem:[#allocation18_spill]] }
 0x8c9   : > { %s3328_s18 = sld [smem:[#allocation27_spill]]  ;;  %32 = sbr.rel (!%p30_p3) target bundleno = 26 (0x1a), region = 182 }
 0x8ca   : > { %s3329_s19 = sld [smem:[#allocation20_spill]] }
 0x8cb   : > { %s3330_s20 = sld [smem:[#allocation21_spill]] }
 0x8cc   : > { %s3331_s21 = sld [smem:[#allocation24_spill]] }
 0x8cd   : > { %s3332_s22 = sld [smem:[#allocation25_spill]] }
 0x8ce   :  { %1876 = vsyncpa [#allocation4], 1 }
 0x8cf   :  { %1878 = vsyncpa [#allocation4 + $0x1], 1 }
 0x8d0   :  { %1879 = vsyncpa [#allocation7], 1 }
 0x8d1   :  { %1881 = vsyncpa [#allocation7 + $0x1], 1 }
 0x8d2   :  { %1882 = vsyncpa [#allocation5], 1 }
 0x8d3   :  { %1884 = vsyncpa [#allocation5 + $0x1], 1 }

</bundles_post_ra>
